<compile_context>
chip_gen: v7x
topology: tpu7x:2x2x1
jax: 0.10.0
libtpu: 0.0.40
codegen_flags: <defaults>
</compile_context>

<pallas_src>
import jax
import jax.numpy as jnp
from jax.experimental import pallas as pl
from jax.experimental.pallas import tpu as pltpu

HIDDEN = 768  # fixed by nn.Linear(768, 768) in the module


def cossim_kernel(x_ref, wlin_ref, b_ref, wkt_ref, o_ref):
    # z = x @ W_lin.T + b   (bf16 operands on the MXU, f32 accumulation + f32 bias)
    z = jnp.dot(
        x_ref[...].astype(jnp.bfloat16),
        wlin_ref[...],
        preferred_element_type=jnp.float32,
    ) + b_ref[...]                                             # [B, H] f32

    # Small matmul first: s = z @ (W_k_normalized * tau).T  -> [B, C]
    # (bf16 x bf16 on the MXU, f32 accumulation; tau already folded into wkt.)
    s = jnp.dot(
        z.astype(jnp.bfloat16),
        wkt_ref[...],
        preferred_element_type=jnp.float32,
    )                                                          # [B, C] f32

    # Row L2-normalize AFTER the matmul: (z/||z||) @ W == (z @ W) / ||z||.
    # rsqrt goes to the EUP; the scale touches only [B, C] instead of [B, H].
    # NOTE: the eps gives F.normalize-style behavior for an all-zero row where
    # a literal z / z.norm() in PyTorch would produce NaN/inf.
    sumsq = jnp.sum(z * z, axis=-1, keepdims=True)             # [B, 1] f32
    o_ref[...] = (s * jax.lax.rsqrt(jnp.maximum(sumsq, 1e-24))).astype(o_ref.dtype)


def prepare_params(w_lin, b_lin, w_k, tau):
    """One-time parameter preprocessing (parameter-load time, NOT the per-call path).

    w_lin: [H_out, H_in] torch Linear layout, b_lin: [H], w_k: [C, H], tau: [1].
    """
    wlin_t = jnp.asarray(w_lin.T, dtype=jnp.bfloat16)            # [H_in, H_out] bf16
    b2d = jnp.asarray(b_lin, dtype=jnp.float32).reshape(1, -1)   # [1, H] f32
    wkn = w_k / jnp.linalg.norm(w_k, axis=1, keepdims=True)      # [C, H] row-normalized
    wkt_tau = jnp.asarray((wkn * tau[0]).T, dtype=jnp.bfloat16)  # [H, C] bf16, tau folded
    return wlin_t, b2d, wkt_tau


def cos_sim_forward(pooled, wlin_t, b2d, wkt_tau):
    """pooled: [B, H] f32, wlin_t: [H, H] bf16 (pre-transposed), b2d: [1, H] f32,
    wkt_tau: [H, C] bf16 (pre-normalized, tau folded) -> scores [B, C] f32."""
    B, H = pooled.shape
    C = wkt_tau.shape[1]

    return pl.pallas_call(
        cossim_kernel,
        out_shape=jax.ShapeDtypeStruct((B, C), jnp.float32),
        grid_spec=pltpu.PrefetchScalarGridSpec(
            num_scalar_prefetch=0,
            grid=(1,),
            in_specs=[
                pl.BlockSpec((B, H), lambda i: (0, 0)),   # pooled_output (f32)
                pl.BlockSpec((H, H), lambda i: (0, 0)),   # W_lin.T (bf16, resident)
                pl.BlockSpec((1, H), lambda i: (0, 0)),   # bias (f32)
                pl.BlockSpec((H, C), lambda i: (0, 0)),   # normalized W_k.T * tau (bf16)
            ],
            out_specs=pl.BlockSpec((B, C), lambda i: (0, 0)),
        ),
        compiler_params=pltpu.CompilerParams(
            dimension_semantics=("arbitrary",)),
    )(pooled, wlin_t, b2d, wkt_tau)


if __name__ == "__main__":
    key = jax.random.PRNGKey(0)
    k_x, k_wl, k_bl, k_wk = jax.random.split(key, 4)

    B = 8            # batch
    NUM_CLASS = 16   # num_of_class

    # TODO(synk): the pretrained BERT encoder (self.bert in get_repr) has no
    # in-script Pallas equivalent; a deterministic stand-in for pooled_output is used.
    pooled = jax.random.normal(k_x, (B, HIDDEN), dtype=jnp.float32)

    # Deterministic synthetic parameters (shapes from __init__/frame()).
    w_lin = jax.random.normal(k_wl, (HIDDEN, HIDDEN), dtype=jnp.float32) * 0.02
    b_lin = jax.random.normal(k_bl, (HIDDEN,), dtype=jnp.float32) * 0.02
    w_k = jax.random.normal(k_wk, (NUM_CLASS, HIDDEN), dtype=jnp.float32) * 0.02
    tau = jnp.array([10.0], dtype=jnp.float32)          # torch.nn.Parameter([10])

    # One-time parameter prep (transpose + bf16 cast + W_k normalize + tau fold).
    wlin_t, b2d, wkt_tau = prepare_params(w_lin, b_lin, w_k, tau)

    out = cos_sim_forward(pooled, wlin_t, b2d, wkt_tau)
    out = jax.block_until_ready(out)
    assert out.shape == (B, NUM_CLASS)

    # Tight check: identical math order / same bf16 quantization as the kernel.
    z_bf = jnp.dot(pooled.astype(jnp.bfloat16), wlin_t,
                   preferred_element_type=jnp.float32) + b_lin
    s_bf = jnp.dot(z_bf.astype(jnp.bfloat16), wkt_tau,
                   preferred_element_type=jnp.float32)
    ref_bf16 = s_bf / jnp.linalg.norm(z_bf, axis=1, keepdims=True)
    assert jnp.allclose(out, ref_bf16, atol=5e-3, rtol=5e-3), \
        float(jnp.max(jnp.abs(out - ref_bf16)))

    # Loose check vs the exact f32 forward semantics of the PyTorch module
    # (bf16 weight/activation storage -> ~1e-2 relative error expected).
    z = pooled @ w_lin.T + b_lin
    zn = z / jnp.linalg.norm(z, axis=1, keepdims=True)
    wkn = w_k / jnp.linalg.norm(w_k, axis=1, keepdims=True)
    ref_f32 = (zn @ wkn.T) * tau[0]
    assert jnp.allclose(out, ref_f32, atol=1e-1, rtol=5e-2), \
        float(jnp.max(jnp.abs(out - ref_f32)))

    print("KERNEL_OK")
</pallas_src>

<mosaic_0001>
module attributes {stable_mosaic.version = 11 : i64} {
  func.func @cossim_kernel(%arg0: i32, %arg1: memref<8x768xf32, #tpu.memory_space<vmem>>, %arg2: memref<768x768xbf16, #tpu.memory_space<vmem>>, %arg3: memref<1x768xf32, #tpu.memory_space<vmem>>, %arg4: memref<768x16xbf16, #tpu.memory_space<vmem>>, %arg5: memref<8x16xf32, #tpu.memory_space<vmem>>) attributes {dimension_semantics = [#tpu.dimension_semantics<arbitrary>], iteration_bounds = array<i64: 1>, scalar_prefetch = 0 : i64, scratch_operands = 0 : i64, tpu.core_type = #tpu.core_type<tc>, window_params = [{pipeline_mode = #tpu.pipeline_mode<synchronous>, transform_indices = @transform_0, window_bounds = array<i64: 8, 768>}, {pipeline_mode = #tpu.pipeline_mode<synchronous>, transform_indices = @transform_1, window_bounds = array<i64: 768, 768>}, {pipeline_mode = #tpu.pipeline_mode<synchronous>, transform_indices = @transform_2, window_bounds = array<i64: 1, 768>}, {pipeline_mode = #tpu.pipeline_mode<synchronous>, transform_indices = @transform_3, window_bounds = array<i64: 768, 16>}, {pipeline_mode = #tpu.pipeline_mode<synchronous>, transform_indices = @transform_4, window_bounds = array<i64: 8, 16>}]} {
    %c0 = arith.constant 0 : index
    %c0_0 = arith.constant 0 : index
    %0 = vector.load %arg1[%c0, %c0_0] : memref<8x768xf32, #tpu.memory_space<vmem>>, vector<8x768xf32>
    %1 = arith.truncf %0 : vector<8x768xf32> to vector<8x768xbf16>
    %c0_1 = arith.constant 0 : index
    %c0_2 = arith.constant 0 : index
    %2 = vector.load %arg2[%c0_1, %c0_2] : memref<768x768xbf16, #tpu.memory_space<vmem>>, vector<768x768xbf16>
    %cst = arith.constant dense<0.000000e+00> : vector<8x768xf32>
    %3 = tpu.matmul %1, %2, %cst {dimension_numbers = #tpu.dot_dimension_numbers<[1], [0], [0], [1], [0, 0, 1, 1], [], []>} : vector<8x768xbf16>, vector<768x768xbf16>, vector<8x768xf32> -> vector<8x768xf32>
    %c0_3 = arith.constant 0 : index
    %c0_4 = arith.constant 0 : index
    %4 = vector.load %arg3[%c0_3, %c0_4] : memref<1x768xf32, #tpu.memory_space<vmem>>, vector<1x768xf32>
    %5 = vector.broadcast %4 : vector<1x768xf32> to vector<8x768xf32>
    %6 = arith.addf %3, %5 : vector<8x768xf32>
    %7 = arith.truncf %6 : vector<8x768xf32> to vector<8x768xbf16>
    %c0_5 = arith.constant 0 : index
    %c0_6 = arith.constant 0 : index
    %8 = vector.load %arg4[%c0_5, %c0_6] : memref<768x16xbf16, #tpu.memory_space<vmem>>, vector<768x16xbf16>
    %cst_7 = arith.constant dense<0.000000e+00> : vector<8x16xf32>
    %9 = tpu.matmul %7, %8, %cst_7 {dimension_numbers = #tpu.dot_dimension_numbers<[1], [0], [0], [1], [0, 0, 1, 1], [], []>} : vector<8x768xbf16>, vector<768x16xbf16>, vector<8x16xf32> -> vector<8x16xf32>
    %10 = arith.mulf %6, %6 : vector<8x768xf32>
    %cst_8 = arith.constant dense<0.000000e+00> : vector<8xf32>
    %11 = vector.multi_reduction <add>, %10, %cst_8 [1] : vector<8x768xf32> to vector<8xf32>
    %12 = vector.shape_cast %11 : vector<8xf32> to vector<8x1xf32>
    %cst_9 = arith.constant 1.000000e-24 : f32
    %13 = vector.broadcast %cst_9 : f32 to vector<8x1xf32>
    %14 = arith.maximumf %12, %13 : vector<8x1xf32>
    %15 = math.rsqrt %14 : vector<8x1xf32>
    %16 = vector.broadcast %15 : vector<8x1xf32> to vector<8x16xf32>
    %17 = arith.mulf %9, %16 : vector<8x16xf32>
    %c0_10 = arith.constant 0 : index
    %c0_11 = arith.constant 0 : index
    %18 = vector.load %arg5[%c0_10, %c0_11] : memref<8x16xf32, #tpu.memory_space<vmem>>, vector<8x16xf32>
    tpu.vector_store %arg5[%c0_10, %c0_11], %17 {strides = array<i32>} : memref<8x16xf32, #tpu.memory_space<vmem>>, vector<8x16xf32>,
    return
  }
  func.func @transform_0(%arg0: i32) -> (i32, i32) {
    %c0_i32 = arith.constant 0 : i32
    %c0_i32_0 = arith.constant 0 : i32
    %c0_i32_1 = arith.constant 0 : i32
    return %c0_i32, %c0_i32_0 : i32, i32
  }
  func.func @transform_1(%arg0: i32) -> (i32, i32) {
    %c0_i32 = arith.constant 0 : i32
    %c0_i32_0 = arith.constant 0 : i32
    %c0_i32_1 = arith.constant 0 : i32
    return %c0_i32, %c0_i32_0 : i32, i32
  }
  func.func @transform_2(%arg0: i32) -> (i32, i32) {
    %c0_i32 = arith.constant 0 : i32
    %c0_i32_0 = arith.constant 0 : i32
    %c0_i32_1 = arith.constant 0 : i32
    return %c0_i32, %c0_i32_0 : i32, i32
  }
  func.func @transform_3(%arg0: i32) -> (i32, i32) {
    %c0_i32 = arith.constant 0 : i32
    %c0_i32_0 = arith.constant 0 : i32
    %c0_i32_1 = arith.constant 0 : i32
    return %c0_i32, %c0_i32_0 : i32, i32
  }
  func.func @transform_4(%arg0: i32) -> (i32, i32) {
    %c0_i32 = arith.constant 0 : i32
    %c0_i32_0 = arith.constant 0 : i32
    %c0_i32_1 = arith.constant 0 : i32
    return %c0_i32, %c0_i32_0 : i32, i32
  }
}

</mosaic_0001>

<bundles_post_ra>
// kernel: tpu_custom_call.1
= control target key start
LH: loop header
LB: loop body
LE: loop exit
PB: predicated region body
PF: predicated region fallthrough
CT: control target
= control target key end

     0   :  { %9 = vsyncpa [#allocation3], 0  ;;  %s4022_s0 = inlined_call_operand.hbm [shape: f32[8,768], index: 0, kind: input, shape index: {}]   ;;  %s4023_s1 = inlined_call_operand.hbm [shape: bf16[768,768], index: 1, kind: input, shape index: {}]   ;;  %s4024_s2 = inlined_call_operand.hbm [shape: f32[1,768], index: 2, kind: input, shape index: {}]   ;;  %s4025_s3 = inlined_call_operand.vmem [shape: bf16[768,16], index: 3, kind: input, shape index: {}]   ;;  %s4026_s4 = inlined_call_operand.hbm [shape: f32[8,16], index: 4, kind: output, shape index: {}]  }
   0x1   :  { %10 = vsyncpa [#allocation6], 0 }
   0x2   :  { %11 = vsyncpa [#allocation4], 0  ;;  %s3753_s15 = smov [#allocation5]   ;;  %s3659_s19 = scalar_lea.hbm %s4023_s1, 36864 }
   0x3   :  { %s27_s16 = sshll.u32 %s3753_s15, 4  ;;  %p3660_p0 = scmp.ne.s32.totalorder %s4023_s1, %s3659_s19  ;;  %s28_s16 = int_to_ptr.vmem [resolvable:$true] %s27_s16 }
   0x4   :  { %p3663_p1 = scmp.lt.u32.totalorder %s3659_s19, %s4023_s1 }
   0x6   :  { %p3665_p2 = pnand %p3663_p1, %p3660_p0 }
   0x8   :  { %3668 = shalt.err (!%p3665_p2)
}
   0x9   :  { %s3669_s24 = scalar_lea.vmem %s28_s16, 36864  ;;  %p3674_p4 = scmp.lt.s32.totalorder %s28_s16, %s28_s16 }
   0xa   :  { %p3670_p3 = scmp.ne.s32.totalorder %s28_s16, %s3669_s24  ;;  %p3675_p5 = scmp.lt.s32.totalorder %s3669_s24, %s3669_s24 }
   0xc   :  { %p3676_p6 = por %p3675_p5, %p3674_p4 }
   0xe   :  { %p3677_p7 = pnand %p3676_p6, %p3670_p3 }
  0x10   :  { %3680 = shalt.err (!%p3677_p7)
}
  0x11   :  { %s3754_s25 = smov 384   ;;  %s3755_s26 = smov 24  }
  0x12   :  { %33 = dma.hbm_to_vmem [thread:$0]  %s4023_s1, 36864, %s28_s16, [#allocation6], %s3754_s25, %s3754_s25, %s3755_s26  }
  0x13   :  { %s3756_s29 = smov [#allocation2]   ;;  %s3757_s5 = smov [#allocation7]  }
  0x14   :  { %s18_s30 = sshll.u32 %s3756_s29, 4  ;;  %s40_s6 = sshll.u32 %s3757_s5, 4  ;;  %s19_s30 = int_to_ptr.vmem [resolvable:$true] %s18_s30  ;;  %s41_s6 = int_to_ptr.vmem [resolvable:$true] %s40_s6 }
  0x15   :  { %s3681_s9 = scalar_lea.hbm %s4022_s0, 768 }
  0x16   :  { %p3682_p8 = scmp.ne.s32.totalorder %s4022_s0, %s3681_s9  ;;  %p3685_p9 = scmp.lt.u32.totalorder %s3681_s9, %s4022_s0 }
  0x18   :  { %p3687_p10 = pnand %p3685_p9, %p3682_p8 }
  0x1a   :  { %3690 = shalt.err (!%p3687_p10)
}
  0x1b   :  { %s3691_s1 = scalar_lea.vmem %s19_s30, 768  ;;  %p3696_p12 = scmp.lt.s32.totalorder %s19_s30, %s19_s30 }
  0x1c   :  { %p3692_p11 = scmp.ne.s32.totalorder %s19_s30, %s3691_s1  ;;  %p3697_p13 = scmp.lt.s32.totalorder %s3691_s1, %s3691_s1 }
  0x1e   :  { %p3698_p0 = por %p3697_p13, %p3696_p12 }
  0x20   :  { %p3699_p1 = pnand %p3698_p0, %p3692_p11 }
  0x22   :  { %3702 = shalt.err (!%p3699_p1)
}
  0x23   :  { %21 = dma.hbm_to_vmem [thread:$0]  %s4022_s0, 768, %s19_s30, [#allocation3]  }
  0x24   :  { %s3703_s18 = scalar_lea.hbm %s4024_s2, 96 }
  0x25   :  { %p3704_p2 = scmp.ne.s32.totalorder %s4024_s2, %s3703_s18  ;;  %p3707_p3 = scmp.lt.u32.totalorder %s3703_s18, %s4024_s2 }
  0x27   :  { %p3709_p4 = pnand %p3707_p3, %p3704_p2 }
  0x29   :  { %3712 = shalt.err (!%p3709_p4)
}
  0x2a   :  { %s3713_s23 = scalar_lea.vmem %s41_s6, 96  ;;  %p3718_p6 = scmp.lt.s32.totalorder %s41_s6, %s41_s6 }
  0x2b   :  { %p3714_p5 = scmp.ne.s32.totalorder %s41_s6, %s3713_s23  ;;  %p3719_p7 = scmp.lt.s32.totalorder %s3713_s23, %s3713_s23 }
  0x2d   :  { %p3720_p8 = por %p3719_p7, %p3718_p6 }
  0x2f   :  { %p3721_p9 = pnand %p3720_p8, %p3714_p5 }
  0x31   :  { %3724 = shalt.err (!%p3721_p9)
}
  0x32   :  { %43 = dma.hbm_to_vmem [thread:$0]  %s4024_s2, 96, %s41_s6, [#allocation6]  }
  0x33   :  { %3747 = dma.done.wait [#allocation3], 768  }
  0x34   :  { %3748 = vsyncadd [#allocation3], 4294966528 }
  0x35   :  { %3749 = dma.done.wait [#allocation6], 36960  }
  0x36   :  { %3750 = vsyncadd [#allocation6], 4294930336  ;;  %v3177_v0 = vld [vmem:[#allocation5 + $0x4] ss:$24 sps:$4 sm:$0xff]   ;;  %v3181_v2 = vld [vmem:[#allocation5] ss:$24 sps:$4 sm:$0xff]  }
  0x37   :  { %v3179_v1 = vld [vmem:[#allocation5 + $0x304] ss:$24 sps:$4 sm:$0xff]   ;;  %1828 = vmatprep.subr.bf16.mxu1 %v3177_v0  ;;  %v3182_v3 = vld [vmem:[#allocation5 + $0x300] ss:$24 sps:$4 sm:$0xff]   ;;  %v3183_v4 = vld [vmem:[#allocation5 + $0x34] ss:$24 sps:$4 sm:$0xff]  }
  0x38   :  { %1869 = vmatprep.subr.bf16.mxu0 %v3179_v1  ;;  %1829 = vmatpush1.bf16.msra.mxu1 %v3181_v2  ;;  %v3185_v5 = vld [vmem:[#allocation5 + $0x334] ss:$24 sps:$4 sm:$0xff]   ;;  %v3187_v6 = vld [vmem:[#allocation5 + $0x30] ss:$24 sps:$4 sm:$0xff]   ;;  %v3189_v8 = vld [vmem:[#allocation5 + $0x64] ss:$24 sps:$4 sm:$0xff]  }
  0x39   :  { %1870 = vmatpush1.bf16.msra.mxu0 %v3182_v3  ;;  %1830 = vmatprep.subr.bf16.mxu1 %v3183_v4  ;;  %v3188_v7 = vld [vmem:[#allocation5 + $0x330] ss:$24 sps:$4 sm:$0xff]   ;;  %v3191_v9 = vld [vmem:[#allocation5 + $0x364] ss:$24 sps:$4 sm:$0xff]   ;;  %v3193_v10 = vld [vmem:[#allocation5 + $0x60] ss:$24 sps:$4 sm:$0xff]  }
  0x3a   :  { %1871 = vmatprep.subr.bf16.mxu0 %v3185_v5  ;;  %v3194_v11 = vld [vmem:[#allocation5 + $0x360] ss:$24 sps:$4 sm:$0xff]   ;;  %v3195_v12 = vld [vmem:[#allocation5 + $0x94] ss:$24 sps:$4 sm:$0xff]   ;;  %v3199_v14 = vld [vmem:[#allocation5 + $0x90] ss:$24 sps:$4 sm:$0xff]  }
  0x3b   :  { %v3197_v13 = vld [vmem:[#allocation5 + $0x394] ss:$24 sps:$4 sm:$0xff]   ;;  %v3200_v15 = vld [vmem:[#allocation5 + $0x390] ss:$24 sps:$4 sm:$0xff]   ;;  %v3201_v16 = vld [vmem:[#allocation5 + $0xc4] ss:$24 sps:$4 sm:$0xff]  }
  0x3c   :  { %1831 = vmatpush1.bf16.msra.mxu1 %v3187_v6  ;;  %v3203_v17 = vld [vmem:[#allocation5 + $0x3c4] ss:$24 sps:$4 sm:$0xff]   ;;  %v3205_v18 = vld [vmem:[#allocation5 + $0xc0] ss:$24 sps:$4 sm:$0xff]   ;;  %v3207_v20 = vld [vmem:[#allocation5 + $0xf4] ss:$24 sps:$4 sm:$0xff]  }
  0x3d   :  { %1872 = vmatpush1.bf16.msra.mxu0 %v3188_v7  ;;  %1832 = vmatprep.subr.bf16.mxu1 %v3189_v8  ;;  %v3206_v19 = vld [vmem:[#allocation5 + $0x3c0] ss:$24 sps:$4 sm:$0xff]   ;;  %v3209_v21 = vld [vmem:[#allocation5 + $0x3f4] ss:$24 sps:$4 sm:$0xff]   ;;  %v3211_v22 = vld [vmem:[#allocation5 + $0xf0] ss:$24 sps:$4 sm:$0xff]  }
  0x3e   :  { %1873 = vmatprep.subr.bf16.mxu0 %v3191_v9  ;;  %v3212_v23 = vld [vmem:[#allocation5 + $0x3f0] ss:$24 sps:$4 sm:$0xff]   ;;  %v3213_v24 = vld [vmem:[#allocation5 + $0x124] ss:$24 sps:$4 sm:$0xff]   ;;  %v3217_v26 = vld [vmem:[#allocation5 + $0x120] ss:$24 sps:$4 sm:$0xff]  }
  0x3f   :  { %v3215_v25 = vld [vmem:[#allocation5 + $0x424] ss:$24 sps:$4 sm:$0xff]   ;;  %v3218_v27 = vld [vmem:[#allocation5 + $0x420] ss:$24 sps:$4 sm:$0xff]   ;;  %v3219_v28 = vld [vmem:[#allocation5 + $0x154] ss:$24 sps:$4 sm:$0xff]  }
  0x40   :  { %1833 = vmatpush1.bf16.msra.mxu1 %v3193_v10  ;;  %v3221_v29 = vld [vmem:[#allocation5 + $0x454] ss:$24 sps:$4 sm:$0xff]   ;;  %v3223_v30 = vld [vmem:[#allocation5 + $0x150] ss:$24 sps:$4 sm:$0xff]   ;;  %v3225_v32 = vld [vmem:[#allocation5 + $0x184] ss:$24 sps:$4 sm:$0xff]  }
  0x41   :  { %1874 = vmatpush1.bf16.msra.mxu0 %v3194_v11  ;;  %1834 = vmatprep.subr.bf16.mxu1 %v3195_v12  ;;  %v3224_v31 = vld [vmem:[#allocation5 + $0x450] ss:$24 sps:$4 sm:$0xff]   ;;  %v3227_v33 = vld [vmem:[#allocation5 + $0x484] ss:$24 sps:$4 sm:$0xff]   ;;  %v3229_v34 = vld [vmem:[#allocation5 + $0x180] ss:$24 sps:$4 sm:$0xff]  }
  0x42   :  { %1875 = vmatprep.subr.bf16.mxu0 %v3197_v13  ;;  %v3230_v35 = vld [vmem:[#allocation5 + $0x480] ss:$24 sps:$4 sm:$0xff]   ;;  %v3231_v36 = vld [vmem:[#allocation5 + $0x1b4] ss:$24 sps:$4 sm:$0xff]   ;;  %v3235_v38 = vld [vmem:[#allocation5 + $0x1b0] ss:$24 sps:$4 sm:$0xff]  }
  0x43   :  { %v3233_v37 = vld [vmem:[#allocation5 + $0x4b4] ss:$24 sps:$4 sm:$0xff]   ;;  %v3236_v39 = vld [vmem:[#allocation5 + $0x4b0] ss:$24 sps:$4 sm:$0xff]   ;;  %v3237_v40 = vld [vmem:[#allocation5 + $0x1e4] ss:$24 sps:$4 sm:$0xff]  }
  0x44   :  { %1835 = vmatpush1.bf16.msra.mxu1 %v3199_v14  ;;  %v3239_v41 = vld [vmem:[#allocation5 + $0x4e4] ss:$24 sps:$4 sm:$0xff]   ;;  %v3241_v42 = vld [vmem:[#allocation5 + $0x1e0] ss:$24 sps:$4 sm:$0xff]   ;;  %v3243_v44 = vld [vmem:[#allocation5 + $0x214] ss:$24 sps:$4 sm:$0xff]  }
  0x45   :  { %1876 = vmatpush1.bf16.msra.mxu0 %v3200_v15  ;;  %1836 = vmatprep.subr.bf16.mxu1 %v3201_v16  ;;  %v3242_v43 = vld [vmem:[#allocation5 + $0x4e0] ss:$24 sps:$4 sm:$0xff]   ;;  %v3245_v45 = vld [vmem:[#allocation5 + $0x514] ss:$24 sps:$4 sm:$0xff]   ;;  %v3247_v49 = vld [vmem:[#allocation5 + $0x210] ss:$24 sps:$4 sm:$0xff]  }
  0x46   :  { %1877 = vmatprep.subr.bf16.mxu0 %v3203_v17  ;;  %v57_v46 = vld [vmem:[#allocation2 + $0x8] sm:$0xff]  ;;  %v59_v48 = vld [vmem:[#allocation2 + $0x18] sm:$0xff]  ;;  %v56_v5 = vld [vmem:[#allocation2] sm:$0xff]  ;;  %vm2723_vm0 = vcmask 130048  }
  0x47   :  { %v3820_v47 = vpack.c.bf16 %v57_v46, %v57_v46  ;;  %v3248_v50 = vld [vmem:[#allocation5 + $0x510] ss:$24 sps:$4 sm:$0xff]   ;;  %v3822_v51 = vpack.c.bf16 %v59_v48, %v59_v48  ;;  %v3249_v52 = vld [vmem:[#allocation5 + $0x244] ss:$24 sps:$4 sm:$0xff]   ;;  %v3253_v54 = vld [vmem:[#allocation5 + $0x240] ss:$24 sps:$4 sm:$0xff]   ;;  %v3826_v10 = vpack.c.bf16 %v56_v5, %v56_v5 }
  0x48   :  { %1837 = vmatpush1.bf16.msra.mxu1 %v3205_v18  ;;  %v3251_v53 = vld [vmem:[#allocation5 + $0x544] ss:$24 sps:$4 sm:$0xff]   ;;  %v3254_v55 = vld [vmem:[#allocation5 + $0x540] ss:$24 sps:$4 sm:$0xff]   ;;  %v3255_v56 = vld [vmem:[#allocation5 + $0x274] ss:$24 sps:$4 sm:$0xff]  }
  0x49   :  { %1878 = vmatpush1.bf16.msra.mxu0 %v3206_v19  ;;  %1838 = vmatprep.subr.bf16.mxu1 %v3207_v20  ;;  %v3257_v57 = vld [vmem:[#allocation5 + $0x574] ss:$24 sps:$4 sm:$0xff]   ;;  %v3259_v58 = vld [vmem:[#allocation5 + $0x270] ss:$24 sps:$4 sm:$0xff]   ;;  %v3261_v60 = vld [vmem:[#allocation5 + $0x2a4] ss:$24 sps:$4 sm:$0xff]  }
  0x4a   :  { %1879 = vmatprep.subr.bf16.mxu0 %v3209_v21  ;;  %1860 = vmatprep.mubr.bf16.mxu1 %v3820_v47  ;;  %v3260_v59 = vld [vmem:[#allocation5 + $0x570] ss:$24 sps:$4 sm:$0xff]   ;;  %v3263_v61 = vld [vmem:[#allocation5 + $0x5a4] ss:$24 sps:$4 sm:$0xff]   ;;  %v3265_v62 = vld [vmem:[#allocation5 + $0x2a0] ss:$24 sps:$4 sm:$0xff]  }
  0x4b   :  { %1901 = vmatprep.mubr.bf16.mxu0 %v3822_v51  ;;  %v3266_v63 = vld [vmem:[#allocation5 + $0x5a0] ss:$24 sps:$4 sm:$0xff]   ;;  %v3267_v0 = vld [vmem:[#allocation5 + $0x2d4] ss:$24 sps:$4 sm:$0xff]   ;;  %v3271_v2 = vld [vmem:[#allocation5 + $0x2d0] ss:$24 sps:$4 sm:$0xff]  }
  0x4c   :  { %1839 = vmatpush1.bf16.msra.mxu1 %v3211_v22  ;;  %v3269_v1 = vld [vmem:[#allocation5 + $0x5d4] ss:$24 sps:$4 sm:$0xff]   ;;  %v3272_v3 = vld [vmem:[#allocation5 + $0x5d0] ss:$24 sps:$4 sm:$0xff]   ;;  %v3275_v4 = vld [vmem:[#allocation5 + $0x604] ss:$24 sps:$4 sm:$0xff]  }
  0x4d   :  { %1880 = vmatpush1.bf16.msra.mxu0 %v3212_v23  ;;  %1840 = vmatprep.subr.bf16.mxu1 %v3213_v24  ;;  %v58_v6 = vld [vmem:[#allocation2 + $0x10] sm:$0xff]  ;;  %v3281_v12 = vld [vmem:[#allocation5 + $0x634] ss:$24 sps:$4 sm:$0xff]   ;;  %v3279_v14 = vld [vmem:[#allocation5 + $0x630] ss:$24 sps:$4 sm:$0xff]  }
  0x4e   :  { %1881 = vmatprep.subr.bf16.mxu0 %v3215_v25  ;;  %v3278_v7 = vld [vmem:[#allocation5 + $0xc] ss:$24 sps:$4 sm:$0xff]   ;;  %v3273_v8 = vld [vmem:[#allocation5 + $0x600] ss:$24 sps:$4 sm:$0xff]   ;;  %v3828_v11 = vpack.c.bf16 %v58_v6, %v58_v6  ;;  %v3284_v13 = vld [vmem:[#allocation5 + $0x3c] ss:$24 sps:$4 sm:$0xff]  }
  0x4f   :  { %v3276_v9 = vld [vmem:[#allocation5 + $0x8] ss:$24 sps:$4 sm:$0xff]   ;;  %v3282_v15 = vld [vmem:[#allocation5 + $0x38] ss:$24 sps:$4 sm:$0xff]   ;;  %v3287_v16 = vld [vmem:[#allocation5 + $0x664] ss:$24 sps:$4 sm:$0xff]  }
  0x50   :  { %1841 = vmatpush1.bf16.msra.mxu1 %v3217_v26  ;;  %v3290_v17 = vld [vmem:[#allocation5 + $0x6c] ss:$24 sps:$4 sm:$0xff]   ;;  %v3285_v18 = vld [vmem:[#allocation5 + $0x660] ss:$24 sps:$4 sm:$0xff]   ;;  %v3296_v21 = vld [vmem:[#allocation5 + $0x9c] ss:$24 sps:$4 sm:$0xff]  }
  0x51   :  { %1882 = vmatpush1.bf16.msra.mxu0 %v3218_v27  ;;  %1842 = vmatprep.subr.bf16.mxu1 %v3219_v28  ;;  %v3288_v19 = vld [vmem:[#allocation5 + $0x68] ss:$24 sps:$4 sm:$0xff]   ;;  %v3293_v20 = vld [vmem:[#allocation5 + $0x694] ss:$24 sps:$4 sm:$0xff]   ;;  %v3294_v23 = vld [vmem:[#allocation5 + $0x98] ss:$24 sps:$4 sm:$0xff]  }
  0x52   :  { %1883 = vmatprep.subr.bf16.mxu0 %v3221_v29  ;;  %v3291_v22 = vld [vmem:[#allocation5 + $0x690] ss:$24 sps:$4 sm:$0xff]   ;;  %v3299_v24 = vld [vmem:[#allocation5 + $0x6c4] ss:$24 sps:$4 sm:$0xff]   ;;  %v3297_v26 = vld [vmem:[#allocation5 + $0x6c0] ss:$24 sps:$4 sm:$0xff]  }
  0x53   :  { %v3302_v25 = vld [vmem:[#allocation5 + $0xcc] ss:$24 sps:$4 sm:$0xff]   ;;  %v3300_v27 = vld [vmem:[#allocation5 + $0xc8] ss:$24 sps:$4 sm:$0xff]   ;;  %v3308_v29 = vld [vmem:[#allocation5 + $0xfc] ss:$24 sps:$4 sm:$0xff]  }
  0x54   :  { %1843 = vmatpush1.bf16.msra.mxu1 %v3223_v30  ;;  %v3305_v28 = vld [vmem:[#allocation5 + $0x6f4] ss:$24 sps:$4 sm:$0xff]   ;;  %v3303_v30 = vld [vmem:[#allocation5 + $0x6f0] ss:$24 sps:$4 sm:$0xff]   ;;  %v3357_v6 = vld [vmem:[#allocation5 + $0x8a0] ss:$24 sps:$4 sm:$0xff]  }
  0x55   :  { %1884 = vmatpush1.bf16.msra.mxu0 %v3224_v31  ;;  %1844 = vmatprep.subr.bf16.mxu1 %v3225_v32  ;;  %v3306_v31 = vld [vmem:[#allocation5 + $0xf8] ss:$24 sps:$4 sm:$0xff]   ;;  %v3311_v32 = vld [vmem:[#allocation5 + $0x724] ss:$24 sps:$4 sm:$0xff]   ;;  %v3329_v46 = vld [vmem:[#allocation5 + $0x7b4] ss:$24 sps:$4 sm:$0xff]  }
  0x56   :  { %1885 = vmatprep.subr.bf16.mxu0 %v3227_v33  ;;  %v3314_v33 = vld [vmem:[#allocation5 + $0x12c] ss:$24 sps:$4 sm:$0xff]   ;;  %v3332_v48 = vld [vmem:[#allocation5 + $0x1bc] ss:$24 sps:$4 sm:$0xff]  }
  0x57   :  { %v3362_v5 = vld [vmem:[#allocation5 + $0x2ac] ss:$24 sps:$4 sm:$0xff]  }
  0x58   :  { %1845 = vmatpush1.bf16.msra.mxu1 %v3229_v34  ;;  %v61_v34 = vld [vmem:[#allocation2 + $0x28] sm:$0xff] }
  0x59   :  { %1886 = vmatpush1.bf16.msra.mxu0 %v3230_v35  ;;  %1846 = vmatprep.subr.bf16.mxu1 %v3231_v36  ;;  %v3833_v35 = vpack.c.bf16 %v61_v34, %v61_v34  ;;  %v3309_v36 = vld [vmem:[#allocation5 + $0x720] ss:$24 sps:$4 sm:$0xff]  }
  0x5a   :  { %1887 = vmatprep.subr.bf16.mxu0 %v3233_v37  ;;  %v3312_v37 = vld [vmem:[#allocation5 + $0x128] ss:$24 sps:$4 sm:$0xff]  }
  0x5b   :  { %v3393_v34 = vld [vmem:[#allocation5 + $0x3c8] ss:$24 sps:$4 sm:$0xff]  }
  0x5c   :  { %1847 = vmatpush1.bf16.msra.mxu1 %v3235_v38  ;;  %v3317_v38 = vld [vmem:[#allocation5 + $0x754] ss:$24 sps:$4 sm:$0xff]  }
  0x5d   :  { %1888 = vmatpush1.bf16.msra.mxu0 %v3236_v39  ;;  %1848 = vmatprep.subr.bf16.mxu1 %v3237_v40  ;;  %v3320_v39 = vld [vmem:[#allocation5 + $0x15c] ss:$24 sps:$4 sm:$0xff]   ;;  %v3315_v40 = vld [vmem:[#allocation5 + $0x750] ss:$24 sps:$4 sm:$0xff]  }
  0x5e   :  { %1889 = vmatprep.subr.bf16.mxu0 %v3239_v41  ;;  %v3318_v41 = vld [vmem:[#allocation5 + $0x158] ss:$24 sps:$4 sm:$0xff]  }
  0x60   :  { %1849 = vmatpush1.bf16.msra.mxu1 %v3241_v42  ;;  %v3323_v42 = vld [vmem:[#allocation5 + $0x784] ss:$24 sps:$4 sm:$0xff]  }
  0x61   :  { %1890 = vmatpush1.bf16.msra.mxu0 %v3242_v43  ;;  %1850 = vmatprep.subr.bf16.mxu1 %v3243_v44  ;;  %v3326_v43 = vld [vmem:[#allocation5 + $0x18c] ss:$24 sps:$4 sm:$0xff]   ;;  %v3321_v44 = vld [vmem:[#allocation5 + $0x780] ss:$24 sps:$4 sm:$0xff]  }
  0x62   :  { %1891 = vmatprep.subr.bf16.mxu0 %v3245_v45  ;;  %v3324_v45 = vld [vmem:[#allocation5 + $0x188] ss:$24 sps:$4 sm:$0xff]  }
  0x64   :  { %1851 = vmatpush1.bf16.msra.mxu1 %v3247_v49  ;;  %v3327_v49 = vld [vmem:[#allocation5 + $0x7b0] ss:$24 sps:$4 sm:$0xff]  }
  0x65   :  { %1892 = vmatpush1.bf16.msra.mxu0 %v3248_v50  ;;  %1852 = vmatprep.subr.bf16.mxu1 %v3249_v52  ;;  %v3330_v50 = vld [vmem:[#allocation5 + $0x1b8] ss:$24 sps:$4 sm:$0xff]   ;;  %v3335_v52 = vld [vmem:[#allocation5 + $0x7e4] ss:$24 sps:$4 sm:$0xff]  }
  0x66   :  { %1893 = vmatprep.subr.bf16.mxu0 %v3251_v53  ;;  %v3338_v53 = vld [vmem:[#allocation5 + $0x1ec] ss:$24 sps:$4 sm:$0xff]  }
  0x68   :  { %1853 = vmatpush1.bf16.msra.mxu1 %v3253_v54  ;;  %v3333_v54 = vld [vmem:[#allocation5 + $0x7e0] ss:$24 sps:$4 sm:$0xff]  }
  0x69   :  { %1894 = vmatpush1.bf16.msra.mxu0 %v3254_v55  ;;  %1854 = vmatprep.subr.bf16.mxu1 %v3255_v56  ;;  %v3336_v55 = vld [vmem:[#allocation5 + $0x1e8] ss:$24 sps:$4 sm:$0xff]   ;;  %v3341_v56 = vld [vmem:[#allocation5 + $0x814] ss:$24 sps:$4 sm:$0xff]  }
  0x6a   :  { %1895 = vmatprep.subr.bf16.mxu0 %v3257_v57  ;;  %v3344_v57 = vld [vmem:[#allocation5 + $0x21c] ss:$24 sps:$4 sm:$0xff]  }
  0x6c   :  { %1855 = vmatpush1.bf16.msra.mxu1 %v3259_v58  ;;  %v3339_v58 = vld [vmem:[#allocation5 + $0x810] ss:$24 sps:$4 sm:$0xff]  }
  0x6d   :  { %1896 = vmatpush1.bf16.msra.mxu0 %v3260_v59  ;;  %1856 = vmatprep.subr.bf16.mxu1 %v3261_v60  ;;  %v3342_v59 = vld [vmem:[#allocation5 + $0x218] ss:$24 sps:$4 sm:$0xff]   ;;  %v3347_v60 = vld [vmem:[#allocation5 + $0x844] ss:$24 sps:$4 sm:$0xff]  }
  0x6e   :  { %1897 = vmatprep.subr.bf16.mxu0 %v3263_v61  ;;  %v3350_v61 = vld [vmem:[#allocation5 + $0x24c] ss:$24 sps:$4 sm:$0xff]  }
  0x70   :  { %1857 = vmatpush1.bf16.msra.mxu1 %v3265_v62  ;;  %v3345_v62 = vld [vmem:[#allocation5 + $0x840] ss:$24 sps:$4 sm:$0xff]  }
  0x71   :  { %1898 = vmatpush1.bf16.msra.mxu0 %v3266_v63  ;;  %1858 = vmatprep.subr.bf16.mxu1 %v3267_v0  ;;  %v3348_v63 = vld [vmem:[#allocation5 + $0x248] ss:$24 sps:$4 sm:$0xff]   ;;  %v3353_v0 = vld [vmem:[#allocation5 + $0x874] ss:$24 sps:$4 sm:$0xff]  }
  0x72   :  { %1899 = vmatprep.subr.bf16.mxu0 %v3269_v1  ;;  %v3356_v1 = vld [vmem:[#allocation5 + $0x27c] ss:$24 sps:$4 sm:$0xff]  }
  0x74   :  { %1859 = vmatpush1.bf16.msra.mxu1 %v3271_v2  ;;  %v3351_v2 = vld [vmem:[#allocation5 + $0x870] ss:$24 sps:$4 sm:$0xff]  }
  0x75   :  { %1900 = vmatpush1.bf16.msra.mxu0 %v3272_v3  ;;  %1951 = vmatprep.subr.bf16.mxu1 %v3278_v7  ;;  %v3354_v3 = vld [vmem:[#allocation5 + $0x278] ss:$24 sps:$4 sm:$0xff]   ;;  %v3360_v7 = vld [vmem:[#allocation5 + $0x2a8] ss:$24 sps:$4 sm:$0xff]  }
  0x76   :  { %1910 = vmatprep.subr.bf16.mxu0 %v3275_v4  ;;  %v3359_v4 = vld [vmem:[#allocation5 + $0x8a4] ss:$24 sps:$4 sm:$0xff]  }
  0x77   :  { %1861 = vmatmul.mubr.bf16.vlgmr.msra.gmra.mrb[0].mxu1 %v3826_v10 }
  0x78   :  { %1902 = vmatmul.mubr.bf16.vlgmr.msra.gmra.mrb[0].mxu0 %v3828_v11  ;;  %1952 = vmatpush1.bf16.msra.mxu1 %v3276_v9  ;;  %v3368_v9 = vld [vmem:[#allocation5 + $0x2dc] ss:$24 sps:$4 sm:$0xff]  }
  0x79   :  { %1911 = vmatpush1.bf16.msra.mxu0 %v3273_v8  ;;  %1953 = vmatprep.subr.bf16.mxu1 %v3284_v13  ;;  %v3365_v8 = vld [vmem:[#allocation5 + $0x8d4] ss:$24 sps:$4 sm:$0xff]   ;;  %v3366_v13 = vld [vmem:[#allocation5 + $0x2d8] ss:$24 sps:$4 sm:$0xff]  }
  0x7a   :  { %1912 = vmatprep.subr.bf16.mxu0 %v3281_v12  ;;  %1983 = vmatprep.mubr.bf16.mxu1 %v3820_v47  ;;  %v3363_v12 = vld [vmem:[#allocation5 + $0x8d0] ss:$24 sps:$4 sm:$0xff]  }
  0x7b   :  { %1942 = vmatprep.mubr.bf16.mxu0 %v3833_v35 }
  0x7c   :  { %1954 = vmatpush1.bf16.msra.mxu1 %v3282_v15  ;;  %v3371_v15 = vld [vmem:[#allocation5 + $0x30c] ss:$24 sps:$4 sm:$0xff]  }
  0x7d   :  { %1913 = vmatpush1.bf16.msra.mxu0 %v3279_v14  ;;  %1955 = vmatprep.subr.bf16.mxu1 %v3290_v17  ;;  %v60_v14 = vld [vmem:[#allocation2 + $0x20] sm:$0xff] }
  0x7e   :  { %1914 = vmatprep.subr.bf16.mxu0 %v3287_v16  ;;  %v3374_v16 = vld [vmem:[#allocation5 + $0x14] ss:$24 sps:$4 sm:$0xff]   ;;  %v3836_v17 = vpack.c.bf16 %v60_v14, %v60_v14  ;;  %v3453_v14 = vld [vmem:[#allocation5 + $0x5a8] ss:$24 sps:$4 sm:$0xff]  }
  0x80   :  { %1956 = vmatpush1.bf16.msra.mxu1 %v3288_v19  ;;  %v3372_v19 = vld [vmem:[#allocation5 + $0x10] ss:$24 sps:$4 sm:$0xff]  }
  0x81   :  { %1915 = vmatpush1.bf16.msra.mxu0 %v3285_v18  ;;  %1957 = vmatprep.subr.bf16.mxu1 %v3296_v21  ;;  %v3369_v18 = vld [vmem:[#allocation5 + $0x308] ss:$24 sps:$4 sm:$0xff]   ;;  %v3380_v21 = vld [vmem:[#allocation5 + $0x44] ss:$24 sps:$4 sm:$0xff]  }
  0x82   :  { %1916 = vmatprep.subr.bf16.mxu0 %v3293_v20  ;;  %v3377_v20 = vld [vmem:[#allocation5 + $0x33c] ss:$24 sps:$4 sm:$0xff]  }
  0x84   :  { %1958 = vmatpush1.bf16.msra.mxu1 %v3294_v23  ;;  %v3378_v23 = vld [vmem:[#allocation5 + $0x40] ss:$24 sps:$4 sm:$0xff]  }
  0x85   :  { %1917 = vmatpush1.bf16.msra.mxu0 %v3291_v22  ;;  %1959 = vmatprep.subr.bf16.mxu1 %v3302_v25  ;;  %v3375_v22 = vld [vmem:[#allocation5 + $0x338] ss:$24 sps:$4 sm:$0xff]   ;;  %v3386_v25 = vld [vmem:[#allocation5 + $0x74] ss:$24 sps:$4 sm:$0xff]  }
  0x86   :  { %1918 = vmatprep.subr.bf16.mxu0 %v3299_v24  ;;  %v3383_v24 = vld [vmem:[#allocation5 + $0x36c] ss:$24 sps:$4 sm:$0xff]  }
  0x88   :  { %1960 = vmatpush1.bf16.msra.mxu1 %v3300_v27  ;;  %v3384_v27 = vld [vmem:[#allocation5 + $0x70] ss:$24 sps:$4 sm:$0xff]  }
  0x89   :  { %1919 = vmatpush1.bf16.msra.mxu0 %v3297_v26  ;;  %1961 = vmatprep.subr.bf16.mxu1 %v3308_v29  ;;  %v3381_v26 = vld [vmem:[#allocation5 + $0x368] ss:$24 sps:$4 sm:$0xff]   ;;  %v3392_v29 = vld [vmem:[#allocation5 + $0xa4] ss:$24 sps:$4 sm:$0xff]  }
  0x8a   :  { %1920 = vmatprep.subr.bf16.mxu0 %v3305_v28  ;;  %v3389_v28 = vld [vmem:[#allocation5 + $0x39c] ss:$24 sps:$4 sm:$0xff]  }
  0x8c   :  { %1962 = vmatpush1.bf16.msra.mxu1 %v3306_v31  ;;  %v3390_v31 = vld [vmem:[#allocation5 + $0xa0] ss:$24 sps:$4 sm:$0xff]  }
  0x8d   :  { %1921 = vmatpush1.bf16.msra.mxu0 %v3303_v30  ;;  %1963 = vmatprep.subr.bf16.mxu1 %v3314_v33  ;;  %v3387_v30 = vld [vmem:[#allocation5 + $0x398] ss:$24 sps:$4 sm:$0xff]   ;;  %v3398_v33 = vld [vmem:[#allocation5 + $0xd4] ss:$24 sps:$4 sm:$0xff]  }
  0x8e   :  { %1922 = vmatprep.subr.bf16.mxu0 %v3311_v32  ;;  %v3395_v32 = vld [vmem:[#allocation5 + $0x3cc] ss:$24 sps:$4 sm:$0xff]  }
  0x90   :  { %1964 = vmatpush1.bf16.msra.mxu1 %v3312_v37  ;;  %v3404_v37 = vld [vmem:[#allocation5 + $0x104] ss:$24 sps:$4 sm:$0xff]  }
  0x91   :  { %1923 = vmatpush1.bf16.msra.mxu0 %v3309_v36  ;;  %1965 = vmatprep.subr.bf16.mxu1 %v3320_v39  ;;  %v3401_v36 = vld [vmem:[#allocation5 + $0x3fc] ss:$24 sps:$4 sm:$0xff]   ;;  %v3402_v39 = vld [vmem:[#allocation5 + $0x100] ss:$24 sps:$4 sm:$0xff]  }
  0x92   :  { %1924 = vmatprep.subr.bf16.mxu0 %v3317_v38  ;;  %v3399_v38 = vld [vmem:[#allocation5 + $0x3f8] ss:$24 sps:$4 sm:$0xff]  }
  0x94   :  { %1966 = vmatpush1.bf16.msra.mxu1 %v3318_v41  ;;  %v3410_v41 = vld [vmem:[#allocation5 + $0x134] ss:$24 sps:$4 sm:$0xff]  }
  0x95   :  { %1925 = vmatpush1.bf16.msra.mxu0 %v3315_v40  ;;  %1967 = vmatprep.subr.bf16.mxu1 %v3326_v43  ;;  %v3407_v40 = vld [vmem:[#allocation5 + $0x42c] ss:$24 sps:$4 sm:$0xff]   ;;  %v3408_v43 = vld [vmem:[#allocation5 + $0x130] ss:$24 sps:$4 sm:$0xff]  }
  0x96   :  { %1926 = vmatprep.subr.bf16.mxu0 %v3323_v42  ;;  %v3405_v42 = vld [vmem:[#allocation5 + $0x428] ss:$24 sps:$4 sm:$0xff]  }
  0x98   :  { %1968 = vmatpush1.bf16.msra.mxu1 %v3324_v45  ;;  %v3416_v45 = vld [vmem:[#allocation5 + $0x164] ss:$24 sps:$4 sm:$0xff]  }
  0x99   :  { %1927 = vmatpush1.bf16.msra.mxu0 %v3321_v44  ;;  %1969 = vmatprep.subr.bf16.mxu1 %v3332_v48  ;;  %v3413_v44 = vld [vmem:[#allocation5 + $0x45c] ss:$24 sps:$4 sm:$0xff]   ;;  %v3414_v48 = vld [vmem:[#allocation5 + $0x160] ss:$24 sps:$4 sm:$0xff]  }
  0x9a   :  { %1928 = vmatprep.subr.bf16.mxu0 %v3329_v46  ;;  %v3411_v46 = vld [vmem:[#allocation5 + $0x458] ss:$24 sps:$4 sm:$0xff]  }
  0x9c   :  { %1970 = vmatpush1.bf16.msra.mxu1 %v3330_v50  ;;  %v3422_v50 = vld [vmem:[#allocation5 + $0x194] ss:$24 sps:$4 sm:$0xff]  }
  0x9d   :  { %1929 = vmatpush1.bf16.msra.mxu0 %v3327_v49  ;;  %1971 = vmatprep.subr.bf16.mxu1 %v3338_v53  ;;  %v3419_v49 = vld [vmem:[#allocation5 + $0x48c] ss:$24 sps:$4 sm:$0xff]   ;;  %v3420_v53 = vld [vmem:[#allocation5 + $0x190] ss:$24 sps:$4 sm:$0xff]  }
  0x9e   :  { %1930 = vmatprep.subr.bf16.mxu0 %v3335_v52  ;;  %v3417_v52 = vld [vmem:[#allocation5 + $0x488] ss:$24 sps:$4 sm:$0xff]  }
  0xa0   :  { %1972 = vmatpush1.bf16.msra.mxu1 %v3336_v55  ;;  %v3428_v55 = vld [vmem:[#allocation5 + $0x1c4] ss:$24 sps:$4 sm:$0xff]  }
  0xa1   :  { %1931 = vmatpush1.bf16.msra.mxu0 %v3333_v54  ;;  %1973 = vmatprep.subr.bf16.mxu1 %v3344_v57  ;;  %v3425_v54 = vld [vmem:[#allocation5 + $0x4bc] ss:$24 sps:$4 sm:$0xff]   ;;  %v3426_v57 = vld [vmem:[#allocation5 + $0x1c0] ss:$24 sps:$4 sm:$0xff]  }
  0xa2   :  { %1932 = vmatprep.subr.bf16.mxu0 %v3341_v56  ;;  %v3423_v56 = vld [vmem:[#allocation5 + $0x4b8] ss:$24 sps:$4 sm:$0xff]  }
  0xa4   :  { %1974 = vmatpush1.bf16.msra.mxu1 %v3342_v59  ;;  %v3434_v59 = vld [vmem:[#allocation5 + $0x1f4] ss:$24 sps:$4 sm:$0xff]  }
  0xa5   :  { %1933 = vmatpush1.bf16.msra.mxu0 %v3339_v58  ;;  %1975 = vmatprep.subr.bf16.mxu1 %v3350_v61  ;;  %v3431_v58 = vld [vmem:[#allocation5 + $0x4ec] ss:$24 sps:$4 sm:$0xff]   ;;  %v3432_v61 = vld [vmem:[#allocation5 + $0x1f0] ss:$24 sps:$4 sm:$0xff]  }
  0xa6   :  { %1934 = vmatprep.subr.bf16.mxu0 %v3347_v60  ;;  %v3429_v60 = vld [vmem:[#allocation5 + $0x4e8] ss:$24 sps:$4 sm:$0xff]  }
  0xa8   :  { %1976 = vmatpush1.bf16.msra.mxu1 %v3348_v63  ;;  %v3440_v63 = vld [vmem:[#allocation5 + $0x224] ss:$24 sps:$4 sm:$0xff]  }
  0xa9   :  { %1935 = vmatpush1.bf16.msra.mxu0 %v3345_v62  ;;  %1977 = vmatprep.subr.bf16.mxu1 %v3356_v1  ;;  %v3437_v62 = vld [vmem:[#allocation5 + $0x51c] ss:$24 sps:$4 sm:$0xff]   ;;  %v3438_v1 = vld [vmem:[#allocation5 + $0x220] ss:$24 sps:$4 sm:$0xff]  }
  0xaa   :  { %1936 = vmatprep.subr.bf16.mxu0 %v3353_v0  ;;  %v3435_v0 = vld [vmem:[#allocation5 + $0x518] ss:$24 sps:$4 sm:$0xff]  }
  0xac   :  { %1978 = vmatpush1.bf16.msra.mxu1 %v3354_v3  ;;  %v3446_v3 = vld [vmem:[#allocation5 + $0x254] ss:$24 sps:$4 sm:$0xff]  }
  0xad   :  { %1937 = vmatpush1.bf16.msra.mxu0 %v3351_v2  ;;  %1979 = vmatprep.subr.bf16.mxu1 %v3362_v5  ;;  %v3443_v2 = vld [vmem:[#allocation5 + $0x54c] ss:$24 sps:$4 sm:$0xff]   ;;  %v3444_v5 = vld [vmem:[#allocation5 + $0x250] ss:$24 sps:$4 sm:$0xff]  }
  0xae   :  { %1938 = vmatprep.subr.bf16.mxu0 %v3359_v4  ;;  %v3441_v4 = vld [vmem:[#allocation5 + $0x548] ss:$24 sps:$4 sm:$0xff]  }
  0xb0   :  { %1980 = vmatpush1.bf16.msra.mxu1 %v3360_v7  ;;  %v3452_v7 = vld [vmem:[#allocation5 + $0x284] ss:$24 sps:$4 sm:$0xff]  }
  0xb1   :  { %1939 = vmatpush1.bf16.msra.mxu0 %v3357_v6  ;;  %1981 = vmatprep.subr.bf16.mxu1 %v3368_v9  ;;  %v3449_v6 = vld [vmem:[#allocation5 + $0x57c] ss:$24 sps:$4 sm:$0xff]   ;;  %v3450_v9 = vld [vmem:[#allocation5 + $0x280] ss:$24 sps:$4 sm:$0xff]  }
  0xb2   :  { %1940 = vmatprep.subr.bf16.mxu0 %v3365_v8  ;;  %v3447_v8 = vld [vmem:[#allocation5 + $0x578] ss:$24 sps:$4 sm:$0xff]  }
  0xb4   :  { %1982 = vmatpush1.bf16.msra.mxu1 %v3366_v13  ;;  %v3458_v13 = vld [vmem:[#allocation5 + $0x2b4] ss:$24 sps:$4 sm:$0xff]  }
  0xb5   :  { %1941 = vmatpush1.bf16.msra.mxu0 %v3363_v12  ;;  %1992 = vmatprep.subr.bf16.mxu1 %v3371_v15  ;;  %v3455_v12 = vld [vmem:[#allocation5 + $0x5ac] ss:$24 sps:$4 sm:$0xff]   ;;  %v3456_v15 = vld [vmem:[#allocation5 + $0x2b0] ss:$24 sps:$4 sm:$0xff]  }
  0xb6   :  { %2074 = vmatprep.subr.bf16.mxu0 %v3374_v16  ;;  %v3461_v16 = vld [vmem:[#allocation5 + $0x5dc] ss:$24 sps:$4 sm:$0xff]  }
  0xb7   :  { %1984 = vmatmul.mubr.bf16.vlgmr.msra.gmra.mrb[4].mxu1 %v3826_v10 }
  0xb8   :  { %1943 = vmatmul.mubr.bf16.vlgmr.msra.gmra.mrb[0].mxu0 %v3836_v17  ;;  %1993 = vmatpush1.bf16.msra.mxu1 %v3369_v18  ;;  %v3464_v18 = vld [vmem:[#allocation5 + $0x2e4] ss:$24 sps:$4 sm:$0xff]  }
  0xb9   :  { %2075 = vmatpush1.bf16.msra.mxu0 %v3372_v19  ;;  %1994 = vmatprep.subr.bf16.mxu1 %v3377_v20  ;;  %v3459_v19 = vld [vmem:[#allocation5 + $0x5d8] ss:$24 sps:$4 sm:$0xff]  }
  0xba   :  { %2076 = vmatprep.subr.bf16.mxu0 %v3380_v21  ;;  %2024 = vmatprep.mubr.bf16.mxu1 %v3822_v51  ;;  %v3462_v20 = vld [vmem:[#allocation5 + $0x2e0] ss:$24 sps:$4 sm:$0xff]   ;;  %v3467_v21 = vld [vmem:[#allocation5 + $0x60c] ss:$24 sps:$4 sm:$0xff]  }
  0xbb   :  { %2106 = vmatprep.mubr.bf16.mxu0 %v3820_v47  ;;  %v3396_v47 = vld [vmem:[#allocation5 + $0xd0] ss:$24 sps:$4 sm:$0xff]  }
  0xbc   :  { %1995 = vmatpush1.bf16.msra.mxu1 %v3375_v22  ;;  %v3470_v22 = vld [vmem:[#allocation5 + $0x314] ss:$24 sps:$4 sm:$0xff]  }
  0xbd   :  { %2077 = vmatpush1.bf16.msra.mxu0 %v3378_v23  ;;  %1996 = vmatprep.subr.bf16.mxu1 %v3383_v24  ;;  %v3465_v23 = vld [vmem:[#allocation5 + $0x608] ss:$24 sps:$4 sm:$0xff]  }
  0xbe   :  { %2078 = vmatprep.subr.bf16.mxu0 %v3386_v25  ;;  %v3468_v24 = vld [vmem:[#allocation5 + $0x310] ss:$24 sps:$4 sm:$0xff]   ;;  %v3473_v25 = vld [vmem:[#allocation5 + $0x63c] ss:$24 sps:$4 sm:$0xff]  }
  0xc0   :  { %1997 = vmatpush1.bf16.msra.mxu1 %v3381_v26  ;;  %v3476_v26 = vld [vmem:[#allocation5 + $0x344] ss:$24 sps:$4 sm:$0xff]  }
  0xc1   :  { %2079 = vmatpush1.bf16.msra.mxu0 %v3384_v27  ;;  %1998 = vmatprep.subr.bf16.mxu1 %v3389_v28  ;;  %v3471_v27 = vld [vmem:[#allocation5 + $0x638] ss:$24 sps:$4 sm:$0xff]  }
  0xc2   :  { %2080 = vmatprep.subr.bf16.mxu0 %v3392_v29  ;;  %v3474_v28 = vld [vmem:[#allocation5 + $0x340] ss:$24 sps:$4 sm:$0xff]   ;;  %v3479_v29 = vld [vmem:[#allocation5 + $0x66c] ss:$24 sps:$4 sm:$0xff]  }
  0xc4   :  { %1999 = vmatpush1.bf16.msra.mxu1 %v3387_v30  ;;  %v3482_v30 = vld [vmem:[#allocation5 + $0x374] ss:$24 sps:$4 sm:$0xff]  }
  0xc5   :  { %2081 = vmatpush1.bf16.msra.mxu0 %v3390_v31  ;;  %2000 = vmatprep.subr.bf16.mxu1 %v3395_v32  ;;  %v3477_v31 = vld [vmem:[#allocation5 + $0x668] ss:$24 sps:$4 sm:$0xff]  }
  0xc6   :  { %2082 = vmatprep.subr.bf16.mxu0 %v3398_v33  ;;  %v3480_v32 = vld [vmem:[#allocation5 + $0x370] ss:$24 sps:$4 sm:$0xff]   ;;  %v3485_v33 = vld [vmem:[#allocation5 + $0x69c] ss:$24 sps:$4 sm:$0xff]  }
  0xc8   :  { %2001 = vmatpush1.bf16.msra.mxu1 %v3393_v34  ;;  %v3488_v34 = vld [vmem:[#allocation5 + $0x3a4] ss:$24 sps:$4 sm:$0xff]  }
  0xc9   :  { %2083 = vmatpush1.bf16.msra.mxu0 %v3396_v47  ;;  %2002 = vmatprep.subr.bf16.mxu1 %v3401_v36  ;;  %v3486_v47 = vld [vmem:[#allocation5 + $0x3a0] ss:$24 sps:$4 sm:$0xff]   ;;  %v3491_v36 = vld [vmem:[#allocation5 + $0x6cc] ss:$24 sps:$4 sm:$0xff]  }
  0xca   :  { %2084 = vmatprep.subr.bf16.mxu0 %v3404_v37  ;;  %v3494_v37 = vld [vmem:[#allocation5 + $0x3d4] ss:$24 sps:$4 sm:$0xff]  }
  0xcc   :  { %2003 = vmatpush1.bf16.msra.mxu1 %v3399_v38  ;;  %v3489_v38 = vld [vmem:[#allocation5 + $0x6c8] ss:$24 sps:$4 sm:$0xff]  }
  0xcd   :  { %2085 = vmatpush1.bf16.msra.mxu0 %v3402_v39  ;;  %2004 = vmatprep.subr.bf16.mxu1 %v3407_v40  ;;  %v3492_v39 = vld [vmem:[#allocation5 + $0x3d0] ss:$24 sps:$4 sm:$0xff]   ;;  %v3497_v40 = vld [vmem:[#allocation5 + $0x6fc] ss:$24 sps:$4 sm:$0xff]  }
  0xce   :  { %2086 = vmatprep.subr.bf16.mxu0 %v3410_v41  ;;  %v3500_v41 = vld [vmem:[#allocation5 + $0x404] ss:$24 sps:$4 sm:$0xff]  }
  0xd0   :  { %2005 = vmatpush1.bf16.msra.mxu1 %v3405_v42  ;;  %v3498_v42 = vld [vmem:[#allocation5 + $0x400] ss:$24 sps:$4 sm:$0xff]  }
  0xd1   :  { %2087 = vmatpush1.bf16.msra.mxu0 %v3408_v43  ;;  %2006 = vmatprep.subr.bf16.mxu1 %v3413_v44  ;;  %v3503_v43 = vld [vmem:[#allocation5 + $0x72c] ss:$24 sps:$4 sm:$0xff]  }
  0xd2   :  { %2088 = vmatprep.subr.bf16.mxu0 %v3416_v45  ;;  %v3506_v44 = vld [vmem:[#allocation5 + $0x434] ss:$24 sps:$4 sm:$0xff]   ;;  %v3501_v45 = vld [vmem:[#allocation5 + $0x728] ss:$24 sps:$4 sm:$0xff]  }
  0xd4   :  { %2007 = vmatpush1.bf16.msra.mxu1 %v3411_v46  ;;  %v3504_v46 = vld [vmem:[#allocation5 + $0x430] ss:$24 sps:$4 sm:$0xff]  }
  0xd5   :  { %2089 = vmatpush1.bf16.msra.mxu0 %v3414_v48  ;;  %2008 = vmatprep.subr.bf16.mxu1 %v3419_v49  ;;  %v3509_v48 = vld [vmem:[#allocation5 + $0x75c] ss:$24 sps:$4 sm:$0xff]  }
  0xd6   :  { %2090 = vmatprep.subr.bf16.mxu0 %v3422_v50  ;;  %v3512_v49 = vld [vmem:[#allocation5 + $0x464] ss:$24 sps:$4 sm:$0xff]   ;;  %v3507_v50 = vld [vmem:[#allocation5 + $0x758] ss:$24 sps:$4 sm:$0xff]  }
  0xd8   :  { %2009 = vmatpush1.bf16.msra.mxu1 %v3417_v52  ;;  %v3510_v52 = vld [vmem:[#allocation5 + $0x460] ss:$24 sps:$4 sm:$0xff]  }
  0xd9   :  { %2091 = vmatpush1.bf16.msra.mxu0 %v3420_v53  ;;  %2010 = vmatprep.subr.bf16.mxu1 %v3425_v54  ;;  %v3515_v53 = vld [vmem:[#allocation5 + $0x78c] ss:$24 sps:$4 sm:$0xff]  }
  0xda   :  { %2092 = vmatprep.subr.bf16.mxu0 %v3428_v55  ;;  %v3518_v54 = vld [vmem:[#allocation5 + $0x494] ss:$24 sps:$4 sm:$0xff]   ;;  %v3513_v55 = vld [vmem:[#allocation5 + $0x788] ss:$24 sps:$4 sm:$0xff]  }
  0xdc   :  { %2011 = vmatpush1.bf16.msra.mxu1 %v3423_v56  ;;  %v3516_v56 = vld [vmem:[#allocation5 + $0x490] ss:$24 sps:$4 sm:$0xff]  }
  0xdd   :  { %2093 = vmatpush1.bf16.msra.mxu0 %v3426_v57  ;;  %2012 = vmatprep.subr.bf16.mxu1 %v3431_v58  ;;  %v3521_v57 = vld [vmem:[#allocation5 + $0x7bc] ss:$24 sps:$4 sm:$0xff]  }
  0xde   :  { %2094 = vmatprep.subr.bf16.mxu0 %v3434_v59  ;;  %v3524_v58 = vld [vmem:[#allocation5 + $0x4c4] ss:$24 sps:$4 sm:$0xff]   ;;  %v3519_v59 = vld [vmem:[#allocation5 + $0x7b8] ss:$24 sps:$4 sm:$0xff]  }
  0xe0   :  { %2013 = vmatpush1.bf16.msra.mxu1 %v3429_v60  ;;  %v3522_v60 = vld [vmem:[#allocation5 + $0x4c0] ss:$24 sps:$4 sm:$0xff]  }
  0xe1   :  { %2095 = vmatpush1.bf16.msra.mxu0 %v3432_v61  ;;  %2014 = vmatprep.subr.bf16.mxu1 %v3437_v62  ;;  %v3527_v61 = vld [vmem:[#allocation5 + $0x7ec] ss:$24 sps:$4 sm:$0xff]  }
  0xe2   :  { %2096 = vmatprep.subr.bf16.mxu0 %v3440_v63  ;;  %v3530_v62 = vld [vmem:[#allocation5 + $0x4f4] ss:$24 sps:$4 sm:$0xff]   ;;  %v3525_v63 = vld [vmem:[#allocation5 + $0x7e8] ss:$24 sps:$4 sm:$0xff]  }
  0xe4   :  { %2015 = vmatpush1.bf16.msra.mxu1 %v3435_v0  ;;  %v3528_v0 = vld [vmem:[#allocation5 + $0x4f0] ss:$24 sps:$4 sm:$0xff]  }
  0xe5   :  { %2097 = vmatpush1.bf16.msra.mxu0 %v3438_v1  ;;  %2016 = vmatprep.subr.bf16.mxu1 %v3443_v2  ;;  %v3533_v1 = vld [vmem:[#allocation5 + $0x81c] ss:$24 sps:$4 sm:$0xff]  }
  0xe6   :  { %2098 = vmatprep.subr.bf16.mxu0 %v3446_v3  ;;  %v3536_v2 = vld [vmem:[#allocation5 + $0x524] ss:$24 sps:$4 sm:$0xff]   ;;  %v3531_v3 = vld [vmem:[#allocation5 + $0x818] ss:$24 sps:$4 sm:$0xff]  }
  0xe8   :  { %2017 = vmatpush1.bf16.msra.mxu1 %v3441_v4  ;;  %v3534_v4 = vld [vmem:[#allocation5 + $0x520] ss:$24 sps:$4 sm:$0xff]  }
  0xe9   :  { %2099 = vmatpush1.bf16.msra.mxu0 %v3444_v5  ;;  %2018 = vmatprep.subr.bf16.mxu1 %v3449_v6  ;;  %v3539_v5 = vld [vmem:[#allocation5 + $0x84c] ss:$24 sps:$4 sm:$0xff]  }
  0xea   :  { %2100 = vmatprep.subr.bf16.mxu0 %v3452_v7  ;;  %v3542_v6 = vld [vmem:[#allocation5 + $0x554] ss:$24 sps:$4 sm:$0xff]   ;;  %v3537_v7 = vld [vmem:[#allocation5 + $0x848] ss:$24 sps:$4 sm:$0xff]  }
  0xec   :  { %2019 = vmatpush1.bf16.msra.mxu1 %v3447_v8  ;;  %v3540_v8 = vld [vmem:[#allocation5 + $0x550] ss:$24 sps:$4 sm:$0xff]  }
  0xed   :  { %2101 = vmatpush1.bf16.msra.mxu0 %v3450_v9  ;;  %2020 = vmatprep.subr.bf16.mxu1 %v3455_v12  ;;  %v3545_v9 = vld [vmem:[#allocation5 + $0x87c] ss:$24 sps:$4 sm:$0xff]  }
  0xee   :  { %2102 = vmatprep.subr.bf16.mxu0 %v3458_v13  ;;  %v3548_v12 = vld [vmem:[#allocation5 + $0x584] ss:$24 sps:$4 sm:$0xff]   ;;  %v3543_v13 = vld [vmem:[#allocation5 + $0x878] ss:$24 sps:$4 sm:$0xff]  }
  0xf0   :  { %2021 = vmatpush1.bf16.msra.mxu1 %v3453_v14  ;;  %v3546_v14 = vld [vmem:[#allocation5 + $0x580] ss:$24 sps:$4 sm:$0xff]  }
  0xf1   :  { %2103 = vmatpush1.bf16.msra.mxu0 %v3456_v15  ;;  %2022 = vmatprep.subr.bf16.mxu1 %v3461_v16  ;;  %v3551_v15 = vld [vmem:[#allocation5 + $0x8ac] ss:$24 sps:$4 sm:$0xff]  }
  0xf2   :  { %2104 = vmatprep.subr.bf16.mxu0 %v3464_v18  ;;  %v3554_v16 = vld [vmem:[#allocation5 + $0x5b4] ss:$24 sps:$4 sm:$0xff]   ;;  %v3549_v18 = vld [vmem:[#allocation5 + $0x8a8] ss:$24 sps:$4 sm:$0xff]  }
  0xf4   :  { %2023 = vmatpush1.bf16.msra.mxu1 %v3459_v19  ;;  %v3552_v19 = vld [vmem:[#allocation5 + $0x5b0] ss:$24 sps:$4 sm:$0xff]  }
  0xf5   :  { %2105 = vmatpush1.bf16.msra.mxu0 %v3462_v20  ;;  %2033 = vmatprep.subr.bf16.mxu1 %v3467_v21  ;;  %v3557_v20 = vld [vmem:[#allocation5 + $0x8dc] ss:$24 sps:$4 sm:$0xff]  }
  0xf6   :  { %2115 = vmatprep.subr.bf16.mxu0 %v3470_v22  ;;  %v3560_v21 = vld [vmem:[#allocation5 + $0x5e4] ss:$24 sps:$4 sm:$0xff]   ;;  %v3555_v22 = vld [vmem:[#allocation5 + $0x8d8] ss:$24 sps:$4 sm:$0xff]  }
  0xf7   :  { %2025 = vmatmul.mubr.bf16.vlgmr.msra.gmra.mrb[4].mxu1 %v3828_v11 }
  0xf8   :  { %2107 = vmatmul.mubr.bf16.vlgmr.msra.gmra.mrb[4].mxu0 %v3826_v10  ;;  %2034 = vmatpush1.bf16.msra.mxu1 %v3465_v23  ;;  %v3483_v10 = vld [vmem:[#allocation5 + $0x698] ss:$24 sps:$4 sm:$0xff]  }
  0xf9   :  { %2116 = vmatpush1.bf16.msra.mxu0 %v3468_v24  ;;  %2035 = vmatprep.subr.bf16.mxu1 %v3473_v25  ;;  %v3558_v23 = vld [vmem:[#allocation5 + $0x5e0] ss:$24 sps:$4 sm:$0xff]   ;;  %v3563_v24 = vld [vmem:[#allocation5 + $0x614] ss:$24 sps:$4 sm:$0xff]  }
  0xfa   :  { %2117 = vmatprep.subr.bf16.mxu0 %v3476_v26  ;;  %2065 = vmatprep.mubr.bf16.mxu1 %v3833_v35  ;;  %v3606_v25 = vld [vmem:[%s4025_s3 + $0x40] sm:$0xff]  }
  0xfb   :  { %2147 = vmatprep.mubr.bf16.mxu0 %v3822_v51  ;;  %v3495_v51 = vld [vmem:[#allocation5 + $0x6f8] ss:$24 sps:$4 sm:$0xff]  }
  0xfc   :  { %2036 = vmatpush1.bf16.msra.mxu1 %v3471_v27  ;;  %v3561_v26 = vld [vmem:[#allocation5 + $0x610] ss:$24 sps:$4 sm:$0xff]  }
  0xfd   :  { %2118 = vmatpush1.bf16.msra.mxu0 %v3474_v28  ;;  %2037 = vmatprep.subr.bf16.mxu1 %v3479_v29  ;;  %v3607_v27 = vld [vmem:[%s4025_s3] sm:$0xff]   ;;  %v3566_v28 = vld [vmem:[#allocation5 + $0x644] ss:$24 sps:$4 sm:$0xff]  }
  0xfe   :  { %2119 = vmatprep.subr.bf16.mxu0 %v3482_v30  ;;  %v3611_v29 = vld [vmem:[%s4025_s3 + $0x48] sm:$0xff]  }
  0xff   :  { %v3564_v30 = vld [vmem:[#allocation5 + $0x640] ss:$24 sps:$4 sm:$0xff]  }
 0x100   :  { %2038 = vmatpush1.bf16.msra.mxu1 %v3477_v31  ;;  %v3612_v31 = vld [vmem:[%s4025_s3 + $0x8] sm:$0xff]  }
 0x101   :  { %2120 = vmatpush1.bf16.msra.mxu0 %v3480_v32  ;;  %2039 = vmatprep.subr.bf16.mxu1 %v3485_v33  ;;  %v3569_v32 = vld [vmem:[#allocation5 + $0x674] ss:$24 sps:$4 sm:$0xff]   ;;  %v3613_v33 = vld [vmem:[%s4025_s3 + $0x50] sm:$0xff]  }
 0x102   :  { %2121 = vmatprep.subr.bf16.mxu0 %v3488_v34  ;;  %v3567_v34 = vld [vmem:[#allocation5 + $0x670] ss:$24 sps:$4 sm:$0xff]  }
 0x104   :  { %2040 = vmatpush1.bf16.msra.mxu1 %v3483_v10  ;;  %v3572_v10 = vld [vmem:[#allocation5 + $0x6a4] ss:$24 sps:$4 sm:$0xff]  }
 0x105   :  { %2122 = vmatpush1.bf16.msra.mxu0 %v3486_v47  ;;  %2041 = vmatprep.subr.bf16.mxu1 %v3491_v36  ;;  %v3615_v47 = vld [vmem:[%s4025_s3 + $0x58] sm:$0xff]   ;;  %v3570_v36 = vld [vmem:[#allocation5 + $0x6a0] ss:$24 sps:$4 sm:$0xff]  }
 0x106   :  { %2123 = vmatprep.subr.bf16.mxu0 %v3494_v37  ;;  %v3575_v37 = vld [vmem:[#allocation5 + $0x6d4] ss:$24 sps:$4 sm:$0xff]  }
 0x108   :  { %2042 = vmatpush1.bf16.msra.mxu1 %v3489_v38  ;;  %v3617_v38 = vld [vmem:[%s4025_s3 + $0x60] sm:$0xff]  }
 0x109   :  { %2124 = vmatpush1.bf16.msra.mxu0 %v3492_v39  ;;  %2043 = vmatprep.subr.bf16.mxu1 %v3497_v40  ;;  %v3573_v39 = vld [vmem:[#allocation5 + $0x6d0] ss:$24 sps:$4 sm:$0xff]  }
 0x10a   :  { %2125 = vmatprep.subr.bf16.mxu0 %v3500_v41  ;;  %v3618_v40 = vld [vmem:[%s4025_s3 + $0x20] sm:$0xff]   ;;  %v3578_v41 = vld [vmem:[#allocation5 + $0x704] ss:$24 sps:$4 sm:$0xff]  }
 0x10c   :  { %2044 = vmatpush1.bf16.msra.mxu1 %v3495_v51  ;;  %v3619_v51 = vld [vmem:[%s4025_s3 + $0x68] sm:$0xff]  }
 0x10d   :  { %2126 = vmatpush1.bf16.msra.mxu0 %v3498_v42  ;;  %2045 = vmatprep.subr.bf16.mxu1 %v3503_v43  ;;  %v3576_v42 = vld [vmem:[#allocation5 + $0x700] ss:$24 sps:$4 sm:$0xff]  }
 0x10e   :  { %2127 = vmatprep.subr.bf16.mxu0 %v3506_v44  ;;  %v3620_v43 = vld [vmem:[%s4025_s3 + $0x28] sm:$0xff]   ;;  %v3581_v44 = vld [vmem:[#allocation5 + $0x734] ss:$24 sps:$4 sm:$0xff]  }
 0x110   :  { %2046 = vmatpush1.bf16.msra.mxu1 %v3501_v45  ;;  %v3621_v45 = vld [vmem:[%s4025_s3 + $0x70] sm:$0xff]  }
 0x111   :  { %2128 = vmatpush1.bf16.msra.mxu0 %v3504_v46  ;;  %2047 = vmatprep.subr.bf16.mxu1 %v3509_v48 }
 0x112   :  { %2129 = vmatprep.subr.bf16.mxu0 %v3512_v49  ;;  %v3579_v49 = vld [vmem:[#allocation5 + $0x730] ss:$24 sps:$4 sm:$0xff]  }
 0x114   :  { %2048 = vmatpush1.bf16.msra.mxu1 %v3507_v50 }
 0x115   :  { %2130 = vmatpush1.bf16.msra.mxu0 %v3510_v52  ;;  %2049 = vmatprep.subr.bf16.mxu1 %v3515_v53  ;;  %v3622_v52 = vld [vmem:[%s4025_s3 + $0x30] sm:$0xff]  }
 0x116   :  { %2131 = vmatprep.subr.bf16.mxu0 %v3518_v54  ;;  %v3584_v53 = vld [vmem:[#allocation5 + $0x764] ss:$24 sps:$4 sm:$0xff]  }
 0x118   :  { %2050 = vmatpush1.bf16.msra.mxu1 %v3513_v55  ;;  %v3623_v55 = vld [vmem:[%s4025_s3 + $0x78] sm:$0xff]  }
 0x119   :  { %2132 = vmatpush1.bf16.msra.mxu0 %v3516_v56  ;;  %2051 = vmatprep.subr.bf16.mxu1 %v3521_v57  ;;  %v3582_v56 = vld [vmem:[#allocation5 + $0x760] ss:$24 sps:$4 sm:$0xff]   ;;  %v3624_v57 = vld [vmem:[%s4025_s3 + $0x38] sm:$0xff]  }
 0x11a   :  { %2133 = vmatprep.subr.bf16.mxu0 %v3524_v58  ;;  %v3587_v58 = vld [vmem:[#allocation5 + $0x794] ss:$24 sps:$4 sm:$0xff]  }
 0x11c   :  { %2052 = vmatpush1.bf16.msra.mxu1 %v3519_v59  ;;  %v3625_v59 = vld [vmem:[%s4025_s3 + $0xc0] sm:$0xff]  }
 0x11d   :  { %2134 = vmatpush1.bf16.msra.mxu0 %v3522_v60  ;;  %2053 = vmatprep.subr.bf16.mxu1 %v3527_v61  ;;  %v3585_v60 = vld [vmem:[#allocation5 + $0x790] ss:$24 sps:$4 sm:$0xff]   ;;  %v3590_v61 = vld [vmem:[#allocation5 + $0x7c4] ss:$24 sps:$4 sm:$0xff]  }
 0x11e   :  { %2135 = vmatprep.subr.bf16.mxu0 %v3530_v62  ;;  %v3588_v62 = vld [vmem:[#allocation5 + $0x7c0] ss:$24 sps:$4 sm:$0xff]  }
 0x120   :  { %2054 = vmatpush1.bf16.msra.mxu1 %v3525_v63  ;;  %v3593_v63 = vld [vmem:[#allocation5 + $0x7f4] ss:$24 sps:$4 sm:$0xff]  }
 0x121   :  { %2136 = vmatpush1.bf16.msra.mxu0 %v3528_v0  ;;  %2055 = vmatprep.subr.bf16.mxu1 %v3533_v1  ;;  %v3591_v0 = vld [vmem:[#allocation5 + $0x7f0] ss:$24 sps:$4 sm:$0xff]   ;;  %v3596_v1 = vld [vmem:[#allocation5 + $0x824] ss:$24 sps:$4 sm:$0xff]  }
 0x122   :  { %2137 = vmatprep.subr.bf16.mxu0 %v3536_v2  ;;  %v3594_v2 = vld [vmem:[#allocation5 + $0x820] ss:$24 sps:$4 sm:$0xff]  }
 0x124   :  { %2056 = vmatpush1.bf16.msra.mxu1 %v3531_v3  ;;  %v3599_v3 = vld [vmem:[#allocation5 + $0x854] ss:$24 sps:$4 sm:$0xff]  }
 0x125   :  { %2138 = vmatpush1.bf16.msra.mxu0 %v3534_v4  ;;  %2057 = vmatprep.subr.bf16.mxu1 %v3539_v5  ;;  %v3597_v4 = vld [vmem:[#allocation5 + $0x850] ss:$24 sps:$4 sm:$0xff]   ;;  %v3602_v5 = vld [vmem:[#allocation5 + $0x884] ss:$24 sps:$4 sm:$0xff]  }
 0x126   :  { %2139 = vmatprep.subr.bf16.mxu0 %v3542_v6  ;;  %v3600_v6 = vld [vmem:[#allocation5 + $0x880] ss:$24 sps:$4 sm:$0xff]  }
 0x128   :  { %2058 = vmatpush1.bf16.msra.mxu1 %v3537_v7  ;;  %v3605_v7 = vld [vmem:[#allocation5 + $0x8b4] ss:$24 sps:$4 sm:$0xff]  }
 0x129   :  { %2140 = vmatpush1.bf16.msra.mxu0 %v3540_v8  ;;  %2059 = vmatprep.subr.bf16.mxu1 %v3545_v9  ;;  %v3603_v8 = vld [vmem:[#allocation5 + $0x8b0] ss:$24 sps:$4 sm:$0xff]   ;;  %v3610_v9 = vld [vmem:[#allocation5 + $0x8e4] ss:$24 sps:$4 sm:$0xff]  }
 0x12a   :  { %2141 = vmatprep.subr.bf16.mxu0 %v3548_v12  ;;  %v3608_v12 = vld [vmem:[#allocation5 + $0x8e0] ss:$24 sps:$4 sm:$0xff]  }
 0x12c   :  { %2060 = vmatpush1.bf16.msra.mxu1 %v3543_v13  ;;  %v358_v13 = vlaneseq }
 0x12d   :  { %2142 = vmatpush1.bf16.msra.mxu0 %v3546_v14  ;;  %2061 = vmatprep.subr.bf16.mxu1 %v3551_v15 }
 0x12e   :  { %2143 = vmatprep.subr.bf16.mxu0 %v3554_v16  ;;  %v3901_v14 = vshrl.u32 %v358_v13, 7  ;;  %v3904_v16 = vld [vmem:[#allocation7] sm:$0x3f] }
 0x12f   :  { %v3654_v13 = vld [vmem:[%s4025_s3 + $0x130] sm:$0xff]  }
 0x130   :  { %2062 = vmatpush1.bf16.msra.mxu1 %v3549_v18  ;;  %v360_v15 = vsub.s32 0, %v3901_v14  ;;  %v364_v18 = vsub.s32 1, %v3901_v14 }
 0x131   :  { %2144 = vmatpush1.bf16.msra.mxu0 %v3552_v19  ;;  %2063 = vmatprep.subr.bf16.mxu1 %v3557_v20 }
 0x132   :  { %2145 = vmatprep.subr.bf16.mxu0 %v3560_v21  ;;  %v361_v19 = vrot.slane %v3904_v16, %v360_v15  ;;  %v365_v20 = vrot.slane %v3904_v16, %v364_v18  ;;  %v3655_v15 = vld [vmem:[%s4025_s3 + $0x178] sm:$0xff]  }
 0x133   :  { %v3656_v18 = vld [vmem:[%s4025_s3 + $0x138] sm:$0xff]  }
 0x134   :  { %2064 = vmatpush1.bf16.msra.mxu1 %v3555_v22 }
 0x135   :  { %2146 = vmatpush1.bf16.msra.mxu0 %v3558_v23  ;;  %3077 = vmatprep.subr.bf16.mxu1 %v3606_v25 }
 0x136   :  { %2156 = vmatprep.subr.bf16.mxu0 %v3563_v24 }
 0x137   :  { %2066 = vmatmul.mubr.bf16.vlgmr.msra.gmra.mrb[4].mxu1 %v3836_v17 }
 0x138   :  { %2148 = vmatmul.mubr.bf16.vlgmr.msra.gmra.mrb[4].mxu0 %v3828_v11  ;;  %3078 = vmatpush3.bf16.msra.mxu1 %v3607_v27  ;;  %v3614_v11 = vld [vmem:[%s4025_s3 + $0x10] sm:$0xff]  }
 0x139   :  { %2157 = vmatpush1.bf16.msra.mxu0 %v3561_v26  ;;  %3079 = vmatprep.subr.bf16.mxu1 %v3611_v29 }
 0x13a   :  { %2158 = vmatprep.subr.bf16.mxu0 %v3566_v28  ;;  %2188 = vmatprep.mubr.bf16.mxu0 %v3833_v35  ;;  %v3616_v35 = vld [vmem:[%s4025_s3 + $0x18] sm:$0xff]  }
 0x13c   :  { %3080 = vmatpush3.bf16.msra.mxu1 %v3612_v31  ;;  %v3626_v31 = vld [vmem:[%s4025_s3 + $0x80] sm:$0xff]  }
 0x13d   :  { %2159 = vmatpush1.bf16.msra.mxu0 %v3564_v30  ;;  %3081 = vmatprep.subr.bf16.mxu1 %v3613_v33  ;;  %v3627_v33 = vld [vmem:[%s4025_s3 + $0xc8] sm:$0xff]  }
 0x13e   :  { %2160 = vmatprep.subr.bf16.mxu0 %v3569_v32 }
 0x140   :  { %3082 = vmatpush3.bf16.msra.mxu1 %v3614_v11  ;;  %v3628_v11 = vld [vmem:[%s4025_s3 + $0x88] sm:$0xff]  }
 0x141   :  { %2161 = vmatpush1.bf16.msra.mxu0 %v3567_v34  ;;  %3083 = vmatprep.subr.bf16.mxu1 %v3615_v47  ;;  %v3630_v47 = vld [vmem:[%s4025_s3 + $0x90] sm:$0xff]  }
 0x142   :  { %2162 = vmatprep.subr.bf16.mxu0 %v3572_v10  ;;  %v3629_v10 = vld [vmem:[%s4025_s3 + $0xd0] sm:$0xff]  }
 0x144   :  { %3084 = vmatpush3.bf16.msra.mxu1 %v3616_v35  ;;  %v3632_v35 = vld [vmem:[%s4025_s3 + $0x98] sm:$0xff]  }
 0x145   :  { %2163 = vmatpush1.bf16.msra.mxu0 %v3570_v36  ;;  %3085 = vmatprep.subr.bf16.mxu1 %v3617_v38  ;;  %v3631_v36 = vld [vmem:[%s4025_s3 + $0xd8] sm:$0xff]   ;;  %v3634_v38 = vld [vmem:[%s4025_s3 + $0xa0] sm:$0xff]  }
 0x146   :  { %2164 = vmatprep.subr.bf16.mxu0 %v3575_v37  ;;  %v3633_v37 = vld [vmem:[%s4025_s3 + $0xe0] sm:$0xff]  }
 0x148   :  { %3086 = vmatpush3.bf16.msra.mxu1 %v3618_v40  ;;  %v3636_v40 = vld [vmem:[%s4025_s3 + $0xa8] sm:$0xff]  }
 0x149   :  { %2165 = vmatpush1.bf16.msra.mxu0 %v3573_v39  ;;  %3087 = vmatprep.subr.bf16.mxu1 %v3619_v51  ;;  %v3635_v39 = vld [vmem:[%s4025_s3 + $0xe8] sm:$0xff]   ;;  %v3638_v51 = vld [vmem:[%s4025_s3 + $0xb0] sm:$0xff]  }
 0x14a   :  { %2166 = vmatprep.subr.bf16.mxu0 %v3578_v41  ;;  %v1862_v46 = vpop.f32.mrb[0].mxu1  ;;  %v3637_v41 = vld [vmem:[%s4025_s3 + $0xf0] sm:$0xff]  }
 0x14b   :  { %v1864_v48 = vpop.f32.mrb[1].mxu1  ;;  %v1863_v21 = vadd.f32 %v1862_v46, %v361_v19  ;;  %v372_v46 = vsub.s32 3, %v3901_v14  ;;  %v376_v19 = vsub.s32 4, %v3901_v14 }
 0x14c   :  { %v1866_v50 = vpop.f32.mrb[2].mxu1  ;;  %3088 = vmatpush3.bf16.msra.mxu1 %v3620_v43  ;;  %v1865_v22 = vadd.f32 %v1864_v48, %v365_v20  ;;  %v3640_v43 = vld [vmem:[%s4025_s3 + $0xb8] sm:$0xff]   ;;  %v380_v20 = vsub.s32 5, %v3901_v14 }
 0x14d   :  { %2167 = vmatpush1.bf16.msra.mxu0 %v3576_v42  ;;  %v1867_v54 = vpop.f32.mrb[3].mxu1  ;;  %3089 = vmatprep.subr.bf16.mxu1 %v3621_v45  ;;  %v3639_v42 = vld [vmem:[%s4025_s3 + $0xf8] sm:$0xff]   ;;  %v368_v45 = vsub.s32 2, %v3901_v14 }
 0x14e   :  { %2168 = vmatprep.subr.bf16.mxu0 %v3581_v44  ;;  %v3641_v44 = vld [vmem:[%s4025_s3 + $0x140] sm:$0xff]  }
 0x14f   :  { %v369_v48 = vrot.slane %v3904_v16, %v368_v45 }
 0x150   :  { %3090 = vmatpush3.bf16.msra.mxu1 %v3622_v52 }
 0x151   :  { %2169 = vmatpush1.bf16.msra.mxu0 %v3579_v49  ;;  %3091 = vmatprep.subr.bf16.mxu1 %v3623_v55  ;;  %v373_v49 = vrot.slane %v3904_v16, %v372_v46 }
 0x152   :  { %2170 = vmatprep.subr.bf16.mxu0 %v3584_v53 }
 0x154   :  { %3092 = vmatpush3.bf16.msra.mxu1 %v3624_v57 }
 0x155   :  { %2171 = vmatpush1.bf16.msra.mxu0 %v3582_v56  ;;  %3099 = vmatprep.subr.bf16.mxu1 %v3625_v59 }
 0x156   :  { %2172 = vmatprep.subr.bf16.mxu0 %v3587_v58 }
 0x159   :  { %2173 = vmatpush1.bf16.msra.mxu0 %v3585_v60  ;;  %v3642_v60 = vld [vmem:[%s4025_s3 + $0x100] sm:$0xff]  }
 0x15a   :  { %2174 = vmatprep.subr.bf16.mxu0 %v3590_v61 }
 0x15d   :  { %2175 = vmatpush1.bf16.msra.mxu0 %v3588_v62 }
 0x15e   :  { %2176 = vmatprep.subr.bf16.mxu0 %v3593_v63  ;;  %v3643_v63 = vld [vmem:[%s4025_s3 + $0x148] sm:$0xff]  }
 0x161   :  { %2177 = vmatpush1.bf16.msra.mxu0 %v3591_v0 }
 0x162   :  { %2178 = vmatprep.subr.bf16.mxu0 %v3596_v1  ;;  %v3644_v1 = vld [vmem:[%s4025_s3 + $0x108] sm:$0xff]  }
 0x165   :  { %2179 = vmatpush1.bf16.msra.mxu0 %v3594_v2  ;;  %v3645_v2 = vld [vmem:[%s4025_s3 + $0x150] sm:$0xff]  }
 0x166   :  { %2180 = vmatprep.subr.bf16.mxu0 %v3599_v3  ;;  %v3646_v3 = vld [vmem:[%s4025_s3 + $0x110] sm:$0xff]  }
 0x169   :  { %2181 = vmatpush1.bf16.msra.mxu0 %v3597_v4  ;;  %v3647_v4 = vld [vmem:[%s4025_s3 + $0x158] sm:$0xff]  }
 0x16a   :  { %2182 = vmatprep.subr.bf16.mxu0 %v3602_v5  ;;  %v3648_v5 = vld [vmem:[%s4025_s3 + $0x118] sm:$0xff]  }
 0x16d   :  { %2183 = vmatpush1.bf16.msra.mxu0 %v3600_v6  ;;  %v3649_v6 = vld [vmem:[%s4025_s3 + $0x160] sm:$0xff]  }
 0x16e   :  { %2184 = vmatprep.subr.bf16.mxu0 %v3605_v7  ;;  %v3650_v7 = vld [vmem:[%s4025_s3 + $0x120] sm:$0xff]  }
 0x171   :  { %2185 = vmatpush1.bf16.msra.mxu0 %v3603_v8  ;;  %v3651_v8 = vld [vmem:[%s4025_s3 + $0x168] sm:$0xff]  }
 0x172   :  { %2186 = vmatprep.subr.bf16.mxu0 %v3610_v9  ;;  %v3652_v9 = vld [vmem:[%s4025_s3 + $0x128] sm:$0xff]  }
 0x175   :  { %2187 = vmatpush1.bf16.msra.mxu0 %v3608_v12  ;;  %v3653_v12 = vld [vmem:[%s4025_s3 + $0x170] sm:$0xff]   ;;  %s3758_s3 = smov [#allocation8]  }
 0x176   :  { %s2731_s7 = sshll.u32 %s3758_s3, 4  ;;  %s2732_s7 = int_to_ptr.vmem [resolvable:$true] %s2731_s7 }
 0x177   :  { %s3725_s8 = scalar_lea.vmem %s2732_s7, 128  ;;  %p3730_p11 = scmp.lt.s32.totalorder %s2732_s7, %s2732_s7 }
 0x178   :  { %2189 = vmatmul.mubr.bf16.vlgmr.msra.gmra.mrb[4].mxu0 %v3836_v17  ;;  %p3726_p10 = scmp.ne.s32.totalorder %s2732_s7, %s3725_s8  ;;  %p3731_p12 = scmp.lt.s32.totalorder %s3725_s8, %s3725_s8 }
 0x17a   :  { %p3732_p13 = por %p3731_p12, %p3730_p11 }
 0x17c   :  { %p3733_p0 = pnand %p3732_p13, %p3726_p10 }
 0x18b   :  { %v1944_v23 = vpop.f32.mrb[0].mxu0 }
 0x18c   :  { %v3144_v24 = vadd.f32 %v1944_v23, %v1863_v21  ;;  %v1946_v25 = vpop.f32.mrb[1].mxu0  ;;  %v377_v21 = vrot.slane %v3904_v16, %v376_v19 }
 0x18d   :  { %v3146_v26 = vadd.f32 %v1946_v25, %v1865_v22  ;;  %v1948_v17 = vpop.f32.mrb[2].mxu0  ;;  %v381_v22 = vrot.slane %v3904_v16, %v380_v20 }
 0x18e   :  { %v2707_v27 = vmul.f32 %v3144_v24, %v3144_v24  ;;  %v1949_v28 = vpop.f32.mrb[3].mxu0  ;;  %v2197_v32 = vpack.c.bf16 %v3144_v24, %v3144_v24 }
 0x18f   :  { %v2198_v29 = vpack.c.bf16 %v3146_v26, %v3146_v26  ;;  %v2708_v30 = vmul.f32 %v3146_v26, %v3146_v26 }
 0x191   :  { %v2713_v34 = vadd.f32 %v2708_v30, %v2707_v27  ;;  %2619 = vmatprep.mubr.bf16.mxu1 %v2198_v29 }
 0x192   :  { %2620 = vmatmul.mubr.bf16.vlgmr.msra.gmra.mrb[8].mxu1 %v2197_v32 }
 0x193   :  { %3100 = vmatpush3.bf16.msra.mxu1 %v3626_v31 }
 0x194   :  { %3101 = vmatprep.subr.bf16.mxu1 %v3627_v33 }
 0x197   :  { %3102 = vmatpush3.bf16.msra.mxu1 %v3628_v11 }
 0x198   :  { %3103 = vmatprep.subr.bf16.mxu1 %v3629_v10 }
 0x19b   :  { %3104 = vmatpush3.bf16.msra.mxu1 %v3630_v47 }
 0x19c   :  { %3105 = vmatprep.subr.bf16.mxu1 %v3631_v36 }
 0x19f   :  { %3106 = vmatpush3.bf16.msra.mxu1 %v3632_v35 }
 0x1a0   :  { %3107 = vmatprep.subr.bf16.mxu1 %v3633_v37 }
 0x1a3   :  { %3108 = vmatpush3.bf16.msra.mxu1 %v3634_v38 }
 0x1a4   :  { %3109 = vmatprep.subr.bf16.mxu1 %v3635_v39 }
 0x1a7   :  { %3110 = vmatpush3.bf16.msra.mxu1 %v3636_v40 }
 0x1a8   :  { %3111 = vmatprep.subr.bf16.mxu1 %v3637_v41 }
 0x1ab   :  { %3112 = vmatpush3.bf16.msra.mxu1 %v3638_v51 }
 0x1ac   :  { %3113 = vmatprep.subr.bf16.mxu1 %v3639_v42 }
 0x1af   :  { %3114 = vmatpush3.bf16.msra.mxu1 %v3640_v43 }
 0x1b0   :  { %3121 = vmatprep.subr.bf16.mxu1 %v3641_v44 }
 0x20a   :  { %v2067_v50 = vpop.f32.mrb[4].mxu1 }
 0x20b   :  { %v3147_v52 = vadd.f32 %v2067_v50, %v369_v48  ;;  %v2069_v53 = vpop.f32.mrb[5].mxu1 }
 0x20c   :  { %v3148_v54 = vadd.f32 %v2069_v53, %v373_v49  ;;  %v2071_v55 = vpop.f32.mrb[6].mxu1 }
 0x20d   :  { %v2709_v56 = vmul.f32 %v3147_v52, %v3147_v52  ;;  %v2072_v57 = vpop.f32.mrb[7].mxu1  ;;  %v2199_v61 = vpack.c.bf16 %v3147_v52, %v3147_v52 }
 0x20e   :  { %v2200_v58 = vpack.c.bf16 %v3148_v54, %v3148_v54  ;;  %v2710_v59 = vmul.f32 %v3148_v54, %v3148_v54 }
 0x20f   :  { %v2714_v62 = vadd.f32 %v2713_v34, %v2709_v56 }
 0x210   :  { %2659 = vmatprep.mubr.bf16.mxu1 %v2200_v58 }
 0x211   :  { %2660 = vmatmul.mubr.bf16.vlgmr.msra.gmra.mrb[12].mxu1 %v2199_v61  ;;  %v2715_v0 = vadd.f32 %v2714_v62, %v2710_v59 }
 0x212   :  { %3122 = vmatpush3.bf16.msra.mxu1 %v3642_v60 }
 0x213   :  { %3123 = vmatprep.subr.bf16.mxu1 %v3643_v63 }
 0x216   :  { %3124 = vmatpush3.bf16.msra.mxu1 %v3644_v1 }
 0x217   :  { %3125 = vmatprep.subr.bf16.mxu1 %v3645_v2 }
 0x21a   :  { %3126 = vmatpush3.bf16.msra.mxu1 %v3646_v3 }
 0x21b   :  { %3127 = vmatprep.subr.bf16.mxu1 %v3647_v4 }
 0x21e   :  { %3128 = vmatpush3.bf16.msra.mxu1 %v3648_v5 }
 0x21f   :  { %3129 = vmatprep.subr.bf16.mxu1 %v3649_v6 }
 0x222   :  { %3130 = vmatpush3.bf16.msra.mxu1 %v3650_v7 }
 0x223   :  { %3131 = vmatprep.subr.bf16.mxu1 %v3651_v8 }
 0x226   :  { %3132 = vmatpush3.bf16.msra.mxu1 %v3652_v9 }
 0x227   :  { %3133 = vmatprep.subr.bf16.mxu1 %v3653_v12 }
 0x22a   :  { %3134 = vmatpush3.bf16.msra.mxu1 %v3654_v13 }
 0x22b   :  { %3135 = vmatprep.subr.bf16.mxu1 %v3655_v15 }
 0x22e   :  { %3136 = vmatpush3.bf16.msra.mxu1 %v3656_v18 }
 0x24b   :  { %v2190_v23 = vpop.f32.mrb[4].mxu0 }
 0x24c   :  { %v3149_v24 = vadd.f32 %v2190_v23, %v377_v21  ;;  %v2192_v25 = vpop.f32.mrb[5].mxu0 }
 0x24d   :  { %v3150_v26 = vadd.f32 %v2192_v25, %v381_v22  ;;  %v2194_v17 = vpop.f32.mrb[6].mxu0 }
 0x24e   :  { %v2711_v27 = vmul.f32 %v3149_v24, %v3149_v24  ;;  %v2195_v28 = vpop.f32.mrb[7].mxu0  ;;  %v2201_v31 = vpack.c.bf16 %v3149_v24, %v3149_v24 }
 0x24f   :  { %v2202_v29 = vpack.c.bf16 %v3150_v26, %v3150_v26  ;;  %v2712_v30 = vmul.f32 %v3150_v26, %v3150_v26 }
 0x250   :  { %v2716_v32 = vadd.f32 %v2715_v0, %v2711_v27 }
 0x251   :  { %2699 = vmatprep.mubr.bf16.mxu1 %v2202_v29 }
 0x252   :  { %2700 = vmatmul.mubr.bf16.vlgmr.msra.gmra.mrb[16].mxu1 %v2201_v31  ;;  %v2717_v33 = vadd.f32 %v2716_v32, %v2712_v30 }
 0x254   :  { %2718 = vadd.xlane.f32.xlu0 %v2717_v33 }
 0x265   :  { %v3093_v14 = vpop.f32.mrb[8].mxu1 }
 0x266   :  { %v3094_v34 = vpop.f32.mrb[9].mxu1 }
 0x267   :  { %v3095_v11 = vadd.f32 %v3094_v34, %v3093_v14  ;;  %v3096_v10 = vpop.f32.mrb[10].mxu1 }
 0x268   :  { %v3097_v16 = vpop.f32.mrb[11].mxu1 }
 0x2e1   :  { %v2719_v40 = vpop.xlane.xlu0 %2718 }
 0x2e2   :  { %v2720_v41 = vmax.f32 %v2719_v40, 1e-24 }
 0x2e4   :  { %v3115_v47 = vpop.f32.mrb[12].mxu1  ;;  %3657 = vrsqrt.f32 %v2720_v41 }
 0x2e5   :  { %v3116_v36 = vpop.f32.mrb[13].mxu1 }
 0x2e6   :  { %v3117_v35 = vadd.f32 %v3116_v36, %v3115_v47  ;;  %v3118_v37 = vpop.f32.mrb[14].mxu1 }
 0x2e7   :  { %v3119_v38 = vpop.f32.mrb[15].mxu1 }
 0x2e8   :  { %v2662_v39 = vadd.f32 %v3117_v35, %v3095_v11 }
 0x2ee   :  { %v3658_v48 = vpop.eup %3657 }
 0x325   :  { %v3137_v51 = vpop.f32.mrb[16].mxu1 }
 0x326   :  { %v3138_v42 = vpop.f32.mrb[17].mxu1 }
 0x327   :  { %v3139_v43 = vadd.f32 %v3138_v42, %v3137_v51  ;;  %v3140_v44 = vpop.f32.mrb[18].mxu1 }
 0x328   :  { %v3141_v45 = vpop.f32.mrb[19].mxu1 }
 0x329   :  { %v2702_v46 = vadd.f32 %v3139_v43, %v2662_v39 }
 0x32b   :  { %v2722_v49 = vmul.f32 %v3658_v48, %v2702_v46 }
 0x32d   :  { %2724 = vst.msk [vmem:[#allocation8] sm:$0xff] %vm2723_vm0, %v2722_v49 }
 0x32e   :  { %3736 = shalt.err (!%p3733_p0)
}
 0x32f   :  { %s3737_s11 = scalar_lea.hbm %s4026_s4, 128 }
 0x330   :  { %p3738_p1 = scmp.ne.s32.totalorder %s4026_s4, %s3737_s11  ;;  %p3741_p2 = scmp.lt.u32.totalorder %s3737_s11, %s4026_s4 }
 0x332   :  { %p3743_p3 = pnand %p3741_p2, %p3738_p1 }
 0x334   :  { %3746 = shalt.err (!%p3743_p3)
}
 0x335   :  { %2734 = dma.vmem_to_hbm [thread:$0]  %s2732_s7, 128, %s4026_s4, [#allocation4]  }
 0x336   :  { %3751 = dma.done.wait [#allocation4], 128  }
 0x337   :  { %3752 = vsyncadd [#allocation4], 4294967168 }
 0x338   :  { %2738 = vsyncpa [#allocation3], 1 }
 0x339   :  { %2739 = vsyncpa [#allocation6], 1 }
 0x33a   :  { %2740 = vsyncpa [#allocation4], 1 }

</bundles_post_ra>
